<compile_context>
chip_gen: v7x
topology: tpu7x:2x2x1
jax: 0.10.0
libtpu: 0.0.40
codegen_flags: <defaults>
</compile_context>

<pallas_src>
import numpy as np
import jax
import jax.numpy as jnp
from jax.experimental import pallas as pl
from jax.experimental.pallas import tpu as pltpu

LATENT_DIM = 2
LAYER_DIMS = [64, 32, 16]
BATCHNORM_IND = 1
BN_EPS = 1e-5
PAD = 128  # lane width every inner layer is padded to


def _round_up(n, m):
    return (n + m - 1) // m * m


# ----------------------------------------------------------------------------
# Kernel
# ----------------------------------------------------------------------------
def _dense_net_kernel(x_ref, w_in_ref, w_mid_ref, b_mid_ref, w_out_ref,
                      b_out_ref, out_ref):
    # Read the bias slab once (whole-ref read, hoisted out of the layer loop).
    b_all = b_mid_ref[...]                          # (8, 128)

    def mm(y, w):
        return jnp.dot(y, w, preferred_element_type=jnp.float32)

    # Layer 0: D_in_pad -> 64 (padded to 128 lanes), ReLU.
    y = jnp.maximum(mm(x_ref[...], w_in_ref[...]) + b_all[0:1, :], 0.0)

    # Six padded [128,128] inner layers, fully unrolled:
    #   0: 64->32 ReLU  (encoder BatchNorm folded into W/b)
    #   1: 32->16 ReLU
    #   2: 16->2  tanh  (bottleneck)
    #   3:  2->16 ReLU
    #   4: 16->32 ReLU  (decoder BatchNorm folded into W/b)
    #   5: 32->64 ReLU
    for li in range(6):
        y = mm(y, w_mid_ref[li]) + b_all[li + 1:li + 2, :]
        y = jnp.tanh(y) if li == 2 else jnp.maximum(y, 0.0)

    # Output layer: 64 -> D_out_pad, tanh.
    out_ref[...] = jnp.tanh(mm(y, w_out_ref[...]) + b_out_ref[...])


# ----------------------------------------------------------------------------
# Parameter init (PyTorch-Linear-style), kept in the original unfused form.
# ----------------------------------------------------------------------------
def init_params(key, input_shape, output_shape):
    d_in = int(np.prod(input_shape))
    d_out = int(np.prod(output_shape))
    enc_dims = [d_in] + LAYER_DIMS               # [D_in, 64, 32, 16]
    dec_dims = [LATENT_DIM] + LAYER_DIMS[::-1]   # [2, 16, 32, 64]

    def linear(k, fan_in, fan_out):
        kw, kb = jax.random.split(k)
        bound = 1.0 / np.sqrt(fan_in)
        w = jax.random.uniform(kw, (fan_in, fan_out), jnp.float32, -bound, bound)
        b = jax.random.uniform(kb, (1, fan_out), jnp.float32, -bound, bound)
        return (w, b)

    def bn_params(k, dim):
        k1, k2 = jax.random.split(k)
        gamma = 1.0 + 0.1 * jax.random.normal(k1, (1, dim), jnp.float32)
        beta = 0.1 * jax.random.normal(k2, (1, dim), jnp.float32)
        mean = 0.05 * jax.random.normal(jax.random.fold_in(k1, 7), (1, dim), jnp.float32)
        var = jnp.ones((1, dim), jnp.float32) + 0.1 * jax.random.uniform(
            jax.random.fold_in(k2, 7), (1, dim), jnp.float32)
        return (gamma, beta, mean, var)

    keys = jax.random.split(key, 10)
    return {
        "enc": [linear(keys[0], enc_dims[0], enc_dims[1]),
                linear(keys[2], enc_dims[1], enc_dims[2]),
                linear(keys[3], enc_dims[2], enc_dims[3])],
        "enc_bn": bn_params(keys[1], enc_dims[1]),       # batchnorm_ind == 1
        "bottleneck": linear(keys[4], LAYER_DIMS[-1], LATENT_DIM),
        "dec": [linear(keys[5], dec_dims[0], dec_dims[1]),
                linear(keys[7], dec_dims[1], dec_dims[2]),
                linear(keys[8], dec_dims[2], dec_dims[3])],
        "dec_bn": bn_params(keys[6], dec_dims[1]),
        "out": linear(keys[9], dec_dims[3], d_out),
    }


# ----------------------------------------------------------------------------
# Prep: fold BatchNorms into the following Dense, zero-pad to 128 lanes,
# concatenate everything into 5 lane-dense slabs.
# ----------------------------------------------------------------------------
def _pad2d(a, rows, cols):
    out = jnp.zeros((rows, cols), jnp.float32)
    return out.at[:a.shape[0], :a.shape[1]].set(a)


def pack_params(params, d_in, d_out):
    d_in_pad = _round_up(d_in, PAD)
    d_out_pad = _round_up(d_out, PAD)

    def bn_scale_shift(bn):
        gamma, beta, mean, var = bn
        s = gamma * jax.lax.rsqrt(var + BN_EPS)          # (1, N)
        t = beta - mean * s
        return s, t

    (w0, b0), (w1, b1), (w2, b2) = params["enc"]
    s_e, t_e = bn_scale_shift(params["enc_bn"])
    # relu(y) -> BN -> dense(W1,b1)  ==  relu(y) -> dense(W1', b1') exactly:
    w1f = s_e.reshape(-1, 1) * w1
    b1f = t_e @ w1 + b1

    (wd0, bd0), (wd1, bd1), (wd2, bd2) = params["dec"]
    s_d, t_d = bn_scale_shift(params["dec_bn"])
    wd1f = s_d.reshape(-1, 1) * wd1
    bd1f = t_d @ wd1 + bd1

    wb, bb = params["bottleneck"]
    wo, bo = params["out"]

    w_in = _pad2d(w0, d_in_pad, PAD)
    w_mid = jnp.stack([_pad2d(w1f, PAD, PAD), _pad2d(w2, PAD, PAD),
                       _pad2d(wb, PAD, PAD), _pad2d(wd0, PAD, PAD),
                       _pad2d(wd1f, PAD, PAD), _pad2d(wd2, PAD, PAD)])
    b_mid = jnp.zeros((8, PAD), jnp.float32)
    for i, b in enumerate([b0, b1f, b2, bb, bd0, bd1f, bd2]):
        b_mid = b_mid.at[i, :b.shape[1]].set(b[0])
    w_out = _pad2d(wo, PAD, d_out_pad)
    b_out = _pad2d(bo, 1, d_out_pad)
    return w_in, w_mid, b_mid, w_out, b_out


# ----------------------------------------------------------------------------
# Wrapper
# ----------------------------------------------------------------------------
def dense_net_forward(x, params, input_shape, output_shape, tile_b=128):
    d_in = int(np.prod(input_shape))
    d_out = int(np.prod(output_shape))
    d_in_pad = _round_up(d_in, PAD)
    d_out_pad = _round_up(d_out, PAD)

    # One forward() call flattens its ENTIRE input (batch dim included); an
    # extra leading axis here stacks B independent calls for MXU utilization.
    single = (x.shape == tuple(input_shape))
    if single:
        x = x[None]
    b = x.shape[0]
    x_rows = x.reshape(b, d_in).astype(jnp.float32)

    tile = min(tile_b, _round_up(b, 8))
    b_pad = _round_up(b, tile)
    if (b_pad, d_in_pad) != (b, d_in):
        x_rows = jnp.zeros((b_pad, d_in_pad), jnp.float32).at[:b, :d_in].set(x_rows)

    w_in, w_mid, b_mid, w_out, b_out = pack_params(params, d_in, d_out)

    out = pl.pallas_call(
        _dense_net_kernel,
        out_shape=jax.ShapeDtypeStruct((b_pad, d_out_pad), jnp.float32),
        grid=(b_pad // tile,),
        in_specs=[
            pl.BlockSpec((tile, d_in_pad), lambda i: (i, 0)),     # x rows
            pl.BlockSpec((d_in_pad, PAD), lambda i: (0, 0)),      # W_in
            pl.BlockSpec((6, PAD, PAD), lambda i: (0, 0, 0)),     # inner W slab
            pl.BlockSpec((8, PAD), lambda i: (0, 0)),             # bias slab
            pl.BlockSpec((PAD, d_out_pad), lambda i: (0, 0)),     # W_out
            pl.BlockSpec((1, d_out_pad), lambda i: (0, 0)),       # b_out
        ],
        out_specs=pl.BlockSpec((tile, d_out_pad), lambda i: (i, 0)),
        compiler_params=pltpu.CompilerParams(
            dimension_semantics=("parallel",)),                   # 2 TCs on v7x
    )(x_rows, w_in, w_mid, b_mid, w_out, b_out)

    out = out[:b, :d_out]
    # TODO(synk): the reference decode() returns self.output_shape (a tuple) and
    # reads `y` before assignment — clearly a bug; we return the computed tensor.
    if single:
        return out.reshape(tuple(output_shape))
    return out.reshape((b,) + tuple(output_shape))


# ----------------------------------------------------------------------------
# Pure-JAX reference (unfused, unpadded) for correctness checking.
# ----------------------------------------------------------------------------
def reference_forward(x_rows, params):
    def dense(y, wb_):
        w, b = wb_
        return y @ w + b

    def bn(y, p):
        g, beta, m, v = p
        return g * (y - m) * jax.lax.rsqrt(v + BN_EPS) + beta

    # TODO(synk): PyTorch BatchNorm1d on a 1-D vector would error in train mode;
    # eval-mode BN (running stats) is implemented here and in the kernel.
    y = jnp.maximum(dense(x_rows, params["enc"][0]), 0.0)
    y = bn(y, params["enc_bn"])
    y = jnp.maximum(dense(y, params["enc"][1]), 0.0)
    y = jnp.maximum(dense(y, params["enc"][2]), 0.0)
    z = jnp.tanh(dense(y, params["bottleneck"]))
    y = jnp.maximum(dense(z, params["dec"][0]), 0.0)
    y = bn(y, params["dec_bn"])
    y = jnp.maximum(dense(y, params["dec"][1]), 0.0)
    y = jnp.maximum(dense(y, params["dec"][2]), 0.0)
    return jnp.tanh(dense(y, params["out"]))


if __name__ == "__main__":
    # One forward call consumes an input of shape (2, 4, 16) -> flattened 128;
    # B = 256 independent calls are stacked so the MXU sees M = 128 per tile.
    input_shape = (2, 4, 16)
    output_shape = (2, 4, 16)
    B = 256

    key = jax.random.PRNGKey(0)
    kx, kp = jax.random.split(key)
    x = jax.random.normal(kx, (B,) + input_shape, dtype=jnp.float32)
    params = init_params(kp, input_shape, output_shape)

    y = dense_net_forward(x, params, input_shape, output_shape)
    jax.block_until_ready(y)
    assert y.shape == (B,) + output_shape and y.dtype == jnp.float32

    # Numerical check against the unfused/unpadded reference.
    d_in = int(np.prod(input_shape))
    d_out = int(np.prod(output_shape))
    ref = reference_forward(x.reshape(B, d_in), params)
    err = float(jnp.max(jnp.abs(y.reshape(B, d_out) - ref)))
    assert err < 2e-2, f"max abs error {err}"

    print("KERNEL_OK")
</pallas_src>

<mosaic_0001>
module attributes {stable_mosaic.version = 11 : i64} {
  func.func @_dense_net_kernel(%arg0: i32, %arg1: memref<128x128xf32, #tpu.memory_space<vmem>>, %arg2: memref<128x128xf32, #tpu.memory_space<vmem>>, %arg3: memref<6x128x128xf32, #tpu.memory_space<vmem>>, %arg4: memref<8x128xf32, #tpu.memory_space<vmem>>, %arg5: memref<128x128xf32, #tpu.memory_space<vmem>>, %arg6: memref<1x128xf32, #tpu.memory_space<vmem>>, %arg7: memref<128x128xf32, #tpu.memory_space<vmem>>) attributes {dimension_semantics = [#tpu.dimension_semantics<parallel>], iteration_bounds = array<i64: 2>, scalar_prefetch = 0 : i64, scratch_operands = 0 : i64, tpu.core_type = #tpu.core_type<tc>, window_params = [{transform_indices = @transform_0, window_bounds = array<i64: 128, 128>}, {pipeline_mode = #tpu.pipeline_mode<synchronous>, transform_indices = @transform_1, window_bounds = array<i64: 128, 128>}, {pipeline_mode = #tpu.pipeline_mode<synchronous>, transform_indices = @transform_2, window_bounds = array<i64: 6, 128, 128>}, {pipeline_mode = #tpu.pipeline_mode<synchronous>, transform_indices = @transform_3, window_bounds = array<i64: 8, 128>}, {pipeline_mode = #tpu.pipeline_mode<synchronous>, transform_indices = @transform_4, window_bounds = array<i64: 128, 128>}, {pipeline_mode = #tpu.pipeline_mode<synchronous>, transform_indices = @transform_5, window_bounds = array<i64: 1, 128>}, {transform_indices = @transform_6, window_bounds = array<i64: 128, 128>}]} {
    %c0 = arith.constant 0 : index
    %c0_0 = arith.constant 0 : index
    %0 = vector.load %arg4[%c0, %c0_0] : memref<8x128xf32, #tpu.memory_space<vmem>>, vector<8x128xf32>
    %c0_1 = arith.constant 0 : index
    %c0_2 = arith.constant 0 : index
    %1 = vector.load %arg1[%c0_1, %c0_2] : memref<128x128xf32, #tpu.memory_space<vmem>>, vector<128x128xf32>
    %c0_3 = arith.constant 0 : index
    %c0_4 = arith.constant 0 : index
    %2 = vector.load %arg2[%c0_3, %c0_4] : memref<128x128xf32, #tpu.memory_space<vmem>>, vector<128x128xf32>
    %cst = arith.constant dense<0.000000e+00> : vector<128x128xf32>
    %3 = tpu.matmul %1, %2, %cst {dimension_numbers = #tpu.dot_dimension_numbers<[1], [0], [0], [1], [0, 0, 1, 1], [], []>} : vector<128x128xf32>, vector<128x128xf32>, vector<128x128xf32> -> vector<128x128xf32>
    %4 = vector.extract_strided_slice %0 {offsets = [0, 0], sizes = [1, 128], strides = [1, 1]} : vector<8x128xf32> to vector<1x128xf32>
    %5 = vector.broadcast %4 : vector<1x128xf32> to vector<128x128xf32>
    %6 = arith.addf %3, %5 : vector<128x128xf32>
    %cst_5 = arith.constant 0.000000e+00 : f32
    %7 = vector.broadcast %cst_5 : f32 to vector<128x128xf32>
    %8 = arith.maximumf %6, %7 : vector<128x128xf32>
    %c0_6 = arith.constant 0 : index
    %c0_7 = arith.constant 0 : index
    %c0_8 = arith.constant 0 : index
    %9 = vector.load %arg3[%c0_6, %c0_7, %c0_8] : memref<6x128x128xf32, #tpu.memory_space<vmem>>, vector<1x128x128xf32>
    %10 = vector.shape_cast %9 : vector<1x128x128xf32> to vector<128x128xf32>
    %cst_9 = arith.constant dense<0.000000e+00> : vector<128x128xf32>
    %11 = tpu.matmul %8, %10, %cst_9 {dimension_numbers = #tpu.dot_dimension_numbers<[1], [0], [0], [1], [0, 0, 1, 1], [], []>} : vector<128x128xf32>, vector<128x128xf32>, vector<128x128xf32> -> vector<128x128xf32>
    %12 = vector.extract_strided_slice %0 {offsets = [1, 0], sizes = [1, 128], strides = [1, 1]} : vector<8x128xf32> to vector<1x128xf32>
    %13 = vector.broadcast %12 : vector<1x128xf32> to vector<128x128xf32>
    %14 = arith.addf %11, %13 : vector<128x128xf32>
    %cst_10 = arith.constant 0.000000e+00 : f32
    %15 = vector.broadcast %cst_10 : f32 to vector<128x128xf32>
    %16 = arith.maximumf %14, %15 : vector<128x128xf32>
    %c1 = arith.constant 1 : index
    %c0_11 = arith.constant 0 : index
    %c0_12 = arith.constant 0 : index
    %17 = vector.load %arg3[%c1, %c0_11, %c0_12] : memref<6x128x128xf32, #tpu.memory_space<vmem>>, vector<1x128x128xf32>
    %18 = vector.shape_cast %17 : vector<1x128x128xf32> to vector<128x128xf32>
    %cst_13 = arith.constant dense<0.000000e+00> : vector<128x128xf32>
    %19 = tpu.matmul %16, %18, %cst_13 {dimension_numbers = #tpu.dot_dimension_numbers<[1], [0], [0], [1], [0, 0, 1, 1], [], []>} : vector<128x128xf32>, vector<128x128xf32>, vector<128x128xf32> -> vector<128x128xf32>
    %20 = vector.extract_strided_slice %0 {offsets = [2, 0], sizes = [1, 128], strides = [1, 1]} : vector<8x128xf32> to vector<1x128xf32>
    %21 = vector.broadcast %20 : vector<1x128xf32> to vector<128x128xf32>
    %22 = arith.addf %19, %21 : vector<128x128xf32>
    %cst_14 = arith.constant 0.000000e+00 : f32
    %23 = vector.broadcast %cst_14 : f32 to vector<128x128xf32>
    %24 = arith.maximumf %22, %23 : vector<128x128xf32>
    %c2 = arith.constant 2 : index
    %c0_15 = arith.constant 0 : index
    %c0_16 = arith.constant 0 : index
    %25 = vector.load %arg3[%c2, %c0_15, %c0_16] : memref<6x128x128xf32, #tpu.memory_space<vmem>>, vector<1x128x128xf32>
    %26 = vector.shape_cast %25 : vector<1x128x128xf32> to vector<128x128xf32>
    %cst_17 = arith.constant dense<0.000000e+00> : vector<128x128xf32>
    %27 = tpu.matmul %24, %26, %cst_17 {dimension_numbers = #tpu.dot_dimension_numbers<[1], [0], [0], [1], [0, 0, 1, 1], [], []>} : vector<128x128xf32>, vector<128x128xf32>, vector<128x128xf32> -> vector<128x128xf32>
    %28 = vector.extract_strided_slice %0 {offsets = [3, 0], sizes = [1, 128], strides = [1, 1]} : vector<8x128xf32> to vector<1x128xf32>
    %29 = vector.broadcast %28 : vector<1x128xf32> to vector<128x128xf32>
    %30 = arith.addf %27, %29 : vector<128x128xf32>
    %31 = math.tanh %30 : vector<128x128xf32>
    %c3 = arith.constant 3 : index
    %c0_18 = arith.constant 0 : index
    %c0_19 = arith.constant 0 : index
    %32 = vector.load %arg3[%c3, %c0_18, %c0_19] : memref<6x128x128xf32, #tpu.memory_space<vmem>>, vector<1x128x128xf32>
    %33 = vector.shape_cast %32 : vector<1x128x128xf32> to vector<128x128xf32>
    %cst_20 = arith.constant dense<0.000000e+00> : vector<128x128xf32>
    %34 = tpu.matmul %31, %33, %cst_20 {dimension_numbers = #tpu.dot_dimension_numbers<[1], [0], [0], [1], [0, 0, 1, 1], [], []>} : vector<128x128xf32>, vector<128x128xf32>, vector<128x128xf32> -> vector<128x128xf32>
    %35 = vector.extract_strided_slice %0 {offsets = [4, 0], sizes = [1, 128], strides = [1, 1]} : vector<8x128xf32> to vector<1x128xf32>
    %36 = vector.broadcast %35 : vector<1x128xf32> to vector<128x128xf32>
    %37 = arith.addf %34, %36 : vector<128x128xf32>
    %cst_21 = arith.constant 0.000000e+00 : f32
    %38 = vector.broadcast %cst_21 : f32 to vector<128x128xf32>
    %39 = arith.maximumf %37, %38 : vector<128x128xf32>
    %c4 = arith.constant 4 : index
    %c0_22 = arith.constant 0 : index
    %c0_23 = arith.constant 0 : index
    %40 = vector.load %arg3[%c4, %c0_22, %c0_23] : memref<6x128x128xf32, #tpu.memory_space<vmem>>, vector<1x128x128xf32>
    %41 = vector.shape_cast %40 : vector<1x128x128xf32> to vector<128x128xf32>
    %cst_24 = arith.constant dense<0.000000e+00> : vector<128x128xf32>
    %42 = tpu.matmul %39, %41, %cst_24 {dimension_numbers = #tpu.dot_dimension_numbers<[1], [0], [0], [1], [0, 0, 1, 1], [], []>} : vector<128x128xf32>, vector<128x128xf32>, vector<128x128xf32> -> vector<128x128xf32>
    %43 = vector.extract_strided_slice %0 {offsets = [5, 0], sizes = [1, 128], strides = [1, 1]} : vector<8x128xf32> to vector<1x128xf32>
    %44 = vector.broadcast %43 : vector<1x128xf32> to vector<128x128xf32>
    %45 = arith.addf %42, %44 : vector<128x128xf32>
    %cst_25 = arith.constant 0.000000e+00 : f32
    %46 = vector.broadcast %cst_25 : f32 to vector<128x128xf32>
    %47 = arith.maximumf %45, %46 : vector<128x128xf32>
    %c5 = arith.constant 5 : index
    %c0_26 = arith.constant 0 : index
    %c0_27 = arith.constant 0 : index
    %48 = vector.load %arg3[%c5, %c0_26, %c0_27] : memref<6x128x128xf32, #tpu.memory_space<vmem>>, vector<1x128x128xf32>
    %49 = vector.shape_cast %48 : vector<1x128x128xf32> to vector<128x128xf32>
    %cst_28 = arith.constant dense<0.000000e+00> : vector<128x128xf32>
    %50 = tpu.matmul %47, %49, %cst_28 {dimension_numbers = #tpu.dot_dimension_numbers<[1], [0], [0], [1], [0, 0, 1, 1], [], []>} : vector<128x128xf32>, vector<128x128xf32>, vector<128x128xf32> -> vector<128x128xf32>
    %51 = vector.extract_strided_slice %0 {offsets = [6, 0], sizes = [1, 128], strides = [1, 1]} : vector<8x128xf32> to vector<1x128xf32>
    %52 = vector.broadcast %51 : vector<1x128xf32> to vector<128x128xf32>
    %53 = arith.addf %50, %52 : vector<128x128xf32>
    %cst_29 = arith.constant 0.000000e+00 : f32
    %54 = vector.broadcast %cst_29 : f32 to vector<128x128xf32>
    %55 = arith.maximumf %53, %54 : vector<128x128xf32>
    %c0_30 = arith.constant 0 : index
    %c0_31 = arith.constant 0 : index
    %56 = vector.load %arg5[%c0_30, %c0_31] : memref<128x128xf32, #tpu.memory_space<vmem>>, vector<128x128xf32>
    %cst_32 = arith.constant dense<0.000000e+00> : vector<128x128xf32>
    %57 = tpu.matmul %55, %56, %cst_32 {dimension_numbers = #tpu.dot_dimension_numbers<[1], [0], [0], [1], [0, 0, 1, 1], [], []>} : vector<128x128xf32>, vector<128x128xf32>, vector<128x128xf32> -> vector<128x128xf32>
    %c0_33 = arith.constant 0 : index
    %c0_34 = arith.constant 0 : index
    %58 = vector.load %arg6[%c0_33, %c0_34] : memref<1x128xf32, #tpu.memory_space<vmem>>, vector<1x128xf32>
    %59 = vector.broadcast %58 : vector<1x128xf32> to vector<128x128xf32>
    %60 = arith.addf %57, %59 : vector<128x128xf32>
    %61 = math.tanh %60 : vector<128x128xf32>
    %c0_35 = arith.constant 0 : index
    %c0_36 = arith.constant 0 : index
    %62 = vector.load %arg7[%c0_35, %c0_36] : memref<128x128xf32, #tpu.memory_space<vmem>>, vector<128x128xf32>
    tpu.vector_store %arg7[%c0_35, %c0_36], %61 {strides = array<i32>} : memref<128x128xf32, #tpu.memory_space<vmem>>, vector<128x128xf32>,
    return
  }
  func.func @transform_0(%arg0: i32) -> (i32, i32) {
    %c0_i32 = arith.constant 0 : i32
    %c0_i32_0 = arith.constant 0 : i32
    return %arg0, %c0_i32 : i32, i32
  }
  func.func @transform_1(%arg0: i32) -> (i32, i32) {
    %c0_i32 = arith.constant 0 : i32
    %c0_i32_0 = arith.constant 0 : i32
    %c0_i32_1 = arith.constant 0 : i32
    return %c0_i32, %c0_i32_0 : i32, i32
  }
  func.func @transform_2(%arg0: i32) -> (i32, i32, i32) {
    %c0_i32 = arith.constant 0 : i32
    %c0_i32_0 = arith.constant 0 : i32
    %c0_i32_1 = arith.constant 0 : i32
    %c0_i32_2 = arith.constant 0 : i32
    return %c0_i32, %c0_i32_0, %c0_i32_1 : i32, i32, i32
  }
  func.func @transform_3(%arg0: i32) -> (i32, i32) {
    %c0_i32 = arith.constant 0 : i32
    %c0_i32_0 = arith.constant 0 : i32
    %c0_i32_1 = arith.constant 0 : i32
    return %c0_i32, %c0_i32_0 : i32, i32
  }
  func.func @transform_4(%arg0: i32) -> (i32, i32) {
    %c0_i32 = arith.constant 0 : i32
    %c0_i32_0 = arith.constant 0 : i32
    %c0_i32_1 = arith.constant 0 : i32
    return %c0_i32, %c0_i32_0 : i32, i32
  }
  func.func @transform_5(%arg0: i32) -> (i32, i32) {
    %c0_i32 = arith.constant 0 : i32
    %c0_i32_0 = arith.constant 0 : i32
    %c0_i32_1 = arith.constant 0 : i32
    return %c0_i32, %c0_i32_0 : i32, i32
  }
  func.func @transform_6(%arg0: i32) -> (i32, i32) {
    %c0_i32 = arith.constant 0 : i32
    %c0_i32_0 = arith.constant 0 : i32
    return %arg0, %c0_i32 : i32, i32
  }
}

</mosaic_0001>

<bundles_post_ra>
// kernel: tpu_custom_call.1
= control target key start
LH: loop header
LB: loop body
LE: loop exit
PB: predicated region body
PF: predicated region fallthrough
CT: control target
= control target key end

     0   :  { %11 = vsyncpa [#allocation3], 0  ;;  %s3661_s0 = inlined_call_operand.hbm [shape: f32[256,128], index: 0, kind: input, shape index: {}]   ;;  %s3662_s1 = inlined_call_operand.hbm [shape: f32[128,128], index: 1, kind: input, shape index: {}]   ;;  %s3663_s2 = inlined_call_operand.hbm [shape: f32[6,128,128], index: 2, kind: input, shape index: {}]   ;;  %s3664_s3 = inlined_call_operand.vmem [shape: f32[8,128], index: 3, kind: input, shape index: {}]   ;;  %s3665_s4 = inlined_call_operand.hbm [shape: f32[128,128], index: 4, kind: input, shape index: {}]   ;;  %s3666_s5 = inlined_call_operand.vmem [shape: f32[1,128], index: 5, kind: input, shape index: {}]   ;;  %s3667_s6 = inlined_call_operand.hbm [shape: f32[256,128], index: 6, kind: output, shape index: {}]  }
   0x1   :  { %13 = vsyncpa [#allocation3 + $0x1], 0 }
   0x2   :  { %14 = vsyncpa [#allocation6], 0 }
   0x3   :  { %15 = vsyncpa [#allocation9], 0 }
   0x4   :  { %16 = vsyncpa [#allocation4], 0 }
   0x5   :  { %18 = vsyncpa [#allocation4 + $0x1], 0  ;;  %s3284_s21 = smov 0   ;;  %s3286_s22 = smov 0  }
   0x6   :  { %s3288_s23 = smov 0   ;;  %s3290_s24 = smov 0  }
   0x7 LB: > { %s3305_s25 = sadd.s32 4294967295, %s3238_s24   ;;  %s1921_s26 = sadd.s32 4294967294, %s3238_s24   ;;  %s3238_s24 = sphi %s3290_s24, %s3690_s24   ;;  %s3234_s23 = sphi %s3288_s23, %s3689_s23   ;;  %s3230_s22 = sphi %s3286_s22, %s3688_s22   ;;  %s3226_s21 = sphi %s3284_s21, %s3687_s21  }
   0x8   : > { %p44_p0 = scmp.ne.s32.totalorder %s3230_s22, %s3226_s21  ;;  %p3668_p1 = scmp.eq.s32.totalorder %s3305_s25, 0 }
   0x9   : > { %p179_p3 = scmp.eq.s32.totalorder %s1921_s26, 1  ;;  %p1922_p5 = scmp.ge.s32.totalorder %s3238_s24, 1 }
   0xa   : > { %p3314_p4 = por %p3668_p1, %p44_p0  ;;  %p186_p7 = scmp.lt.s32.totalorder %s3238_s24, 3 }
   0xb   : > { %p3319_p6 = por %p179_p3, %p44_p0  ;;  %s3240_s30 = smov [#allocation5]  }
   0xc   : > { %s3671_s27 = scalar_select %p3314_p4, 1, 0 }
   0xd   : > { %s3672_s28 = scalar_select %p3319_p6, 1, 0 }
   0xe   : > { %p3324_p8 = pnand %p1922_p5, %p186_p7  ;;  %s198_s7 = sshll.u32 %s3240_s30, 4  ;;  %s3328_s7 = int_to_ptr.vmem [resolvable:$true] %s198_s7 }
   0xf   : > { %s3241_s9 = smov [#allocation7]   ;;  %s3242_s11 = smov [#allocation8]  }
  0x10   : > { %s3673_s29 = scalar_select %p3324_p8, 1, 0 }
  0x11   : > { %p2920_p9 = pneg %p3324_p8  ;;  %s211_s10 = sshll.u32 %s3241_s9, 4  ;;  %s3339_s10 = int_to_ptr.vmem [resolvable:$true] %s211_s10 }
  0x12   : > { %s3341_s12 = sshll.u32 %s3242_s11, 4  ;;  %s3050_s15 = scalar_lea.hbm %s3662_s1, 2048  ;;  %s228_s12 = int_to_ptr.vmem [resolvable:$true] %s3341_s12 }
  0x13   : > { %p3335_p11 = pnand %p2920_p9, %p3668_p1  ;;  %p3051_p12 = scmp.ne.s32.totalorder %s3662_s1, %s3050_s15 }
  0x14   : > { %p3057_p5 = scmp.lt.u32.totalorder %s3050_s15, %s3662_s1 }
  0x15   : > { %p3351_p13 = pneg %p3335_p11 }
  0x17   : > { %p3053_p0 = pnand %p3351_p13, %p3051_p12 }
  0x19   : > { %p3054_p3 = pneg %p3053_p0 }
  0x1b   : > { %p3059_p7 = pnand %p3057_p5, %p3054_p3 }
  0x1d   : > { %3062 = shalt.err (!%p3059_p7)
}
  0x1e   : > { %s3063_s26 = scalar_lea.vmem %s3328_s7, 2048  ;;  %p3071_p2 = scmp.lt.s32.totalorder %s3328_s7, %s3328_s7 }
  0x1f   : > { %p3064_p9 = scmp.ne.s32.totalorder %s3328_s7, %s3063_s26  ;;  %p3072_p6 = scmp.lt.s32.totalorder %s3063_s26, %s3063_s26 }
  0x21   : > { %p3066_p10 = pnand %p3064_p9, %p3351_p13  ;;  %p3073_p12 = por %p3072_p6, %p3071_p2 }
  0x23   : > { %p3067_p1 = pneg %p3066_p10 }
  0x25   : > { %p3074_p0 = pnand %p3073_p12, %p3067_p1 }
  0x27   : > { %3077 = shalt.err (!%p3074_p0)
}
  0x28   : > { %s3243_s30 = smov 128   ;;  %s3244_s9 = smov 8  }
  0x29   : > { %2923 = dma.hbm_to_vmem [thread:$0]  (!%p3335_p11), %s3662_s1, 2048, %s3328_s7, [#allocation6], %s3243_s30, %s3243_s30, %s3244_s9  }
  0x2a   : > { %s3078_s16 = scalar_lea.hbm %s3663_s2, 12288 }
  0x2b   : > { %p3079_p1 = scmp.ne.s32.totalorder %s3663_s2, %s3078_s16  ;;  %p3085_p10 = scmp.lt.u32.totalorder %s3078_s16, %s3663_s2 }
  0x2d   : > { %p3081_p2 = pnand %p3079_p1, %p3351_p13 }
  0x2f   : > { %p3082_p6 = pneg %p3081_p2 }
  0x31   : > { %p3087_p3 = pnand %p3085_p10, %p3082_p6 }
  0x33   : > { %3090 = shalt.err (!%p3087_p3)
}
  0x34   : > { %s3091_s7 = scalar_lea.vmem %s3339_s10, 12288  ;;  %p3099_p12 = scmp.lt.s32.totalorder %s3339_s10, %s3339_s10 }
  0x35   : > { %p3092_p5 = scmp.ne.s32.totalorder %s3339_s10, %s3091_s7  ;;  %p3100_p0 = scmp.lt.s32.totalorder %s3091_s7, %s3091_s7 }
  0x37   : > { %p3094_p7 = pnand %p3092_p5, %p3351_p13  ;;  %p3101_p1 = por %p3100_p0, %p3099_p12 }
  0x39   : > { %p3095_p9 = pneg %p3094_p7 }
  0x3b   : > { %p3102_p2 = pnand %p3101_p1, %p3095_p9 }
  0x3d   : > { %3105 = shalt.err (!%p3102_p2)
}
  0x3e   : > { %2926 = dma.hbm_to_vmem [thread:$0]  (!%p3335_p11), %s3663_s2, 12288, %s3339_s10, [#allocation6], %s3243_s30, %s3243_s30, %s3244_s9  }
  0x3f   : > { %s3106_s16 = scalar_lea.hbm %s3665_s4, 2048 }
  0x40   : > { %p3107_p6 = scmp.ne.s32.totalorder %s3665_s4, %s3106_s16  ;;  %p3113_p5 = scmp.lt.u32.totalorder %s3106_s16, %s3665_s4 }
  0x42   : > { %p3109_p10 = pnand %p3107_p6, %p3351_p13 }
  0x44   : > { %p3110_p3 = pneg %p3109_p10 }
  0x46   : > { %p3115_p7 = pnand %p3113_p5, %p3110_p3 }
  0x48   : > { %3118 = shalt.err (!%p3115_p7)
}
  0x49   : > { %s3119_s7 = scalar_lea.vmem %s228_s12, 2048  ;;  %p3127_p1 = scmp.lt.s32.totalorder %s228_s12, %s228_s12 }
  0x4a   : > { %p3120_p9 = scmp.ne.s32.totalorder %s228_s12, %s3119_s7  ;;  %p3128_p2 = scmp.lt.s32.totalorder %s3119_s7, %s3119_s7 }
  0x4c   : > { %p3122_p12 = pnand %p3120_p9, %p3351_p13  ;;  %p3129_p4 = por %p3128_p2, %p3127_p1 }
  0x4e   : > { %p3123_p0 = pneg %p3122_p12 }
  0x50   : > { %p3130_p8 = pnand %p3129_p4, %p3123_p0 }
  0x52   : > { %3133 = shalt.err (!%p3130_p8)
}
  0x53   : > { %2929 = dma.hbm_to_vmem [thread:$0]  (!%p3335_p11), %s3665_s4, 2048, %s228_s12, [#allocation9], %s3243_s30, %s3243_s30, %s3244_s9  }
  0x54   : > { %s3424_s18 = sadd.s32 1, %s3238_s24   ;;  %s31_s13 = sadd.s32 1, %s3234_s23 }
  0x55   : > { %s28_s8 = ssub.s32 %s3238_s24, %s3424_s18  ;;  %p38_p8 = scmp.ne.s32.totalorder %s3234_s23, %s3230_s22 }
  0x56   : > { %p29_p4 = scmp.eq.s32.totalorder %s28_s8, 0  ;;  %p39_p13 = scmp.eq.s32.totalorder %s3238_s24, 0 }
  0x57   : > { %p2941_p6 = scmp.lt.s32.totalorder %s3238_s24, 2  ;;  %p3676_p3 = scmp.eq.s32.totalorder %s3305_s25, 1 }
  0x58   : > { %s3434_s14 = scalar_select %p29_p4, %s3234_s23, %s31_s13  }
  0x59   : > { %p40_p10 = por %p39_p13, %p38_p8  ;;  %p3438_p5 = por %p3676_p3, %p38_p8 }
  0x5a   : > { %s244_s16 = sand.u32 1, %s3234_s23   ;;  %s1942_s17 = sshll.u32 %s3238_s24, 11 }
  0x5b   : > { %s1927_s12 = sshll.u32 %s244_s16, 7  ;;  %s3447_s26 = scalar_lea.hbm %s3661_s0, %s1942_s17 }
  0x5c   : > { %s248_s7 = scalar_lea.vmem [#allocation2], %s1927_s12  ;;  %p3449_p11 = pnand %p2941_p6, %p40_p10 }
  0x5d   : > { %s255_s10 = sshll.u32 %s248_s7, 4  ;;  %s3455_s8 = scalar_lea.sflag [#allocation3], %s244_s16  ;;  %s3453_s10 = int_to_ptr.vmem [resolvable:$true] %s255_s10 }
  0x5e   : > { %s3134_s13 = scalar_lea.hbm %s3447_s26, 2048  ;;  %p3136_p9 = pneg %p3449_p11 }
  0x5f   : > { %p3135_p7 = scmp.ne.s32.totalorder %s3447_s26, %s3134_s13  ;;  %s3139_s19 = scalar_lea.hbm %s3661_s0, 4096 }
  0x60   : > { %p3140_p1 = scmp.lt.u32.totalorder %s3447_s26, %s3661_s0  ;;  %p3141_p2 = scmp.lt.u32.totalorder %s3139_s19, %s3134_s13 }
  0x61   : > { %p3137_p12 = pnand %p3136_p9, %p3135_p7  ;;  %p3143_p8 = scmp.lt.u32.totalorder %s3134_s13, %s3447_s26 }
  0x62   : > { %p3142_p4 = por %p3141_p2, %p3140_p1 }
  0x63   : > { %p3138_p0 = pneg %p3137_p12 }
  0x64   : > { %p3144_p13 = por %p3143_p8, %p3142_p4 }
  0x66   : > { %p3145_p6 = pnand %p3144_p13, %p3138_p0 }
  0x68   : > { %3148 = shalt.err (!%p3145_p6)
}
  0x69   : > { %s3149_s16 = scalar_lea.vmem %s3453_s10, 2048  ;;  %s3245_s17 = smov [#allocation2]  }
  0x6a   : > { %p3150_p10 = scmp.ne.s32.totalorder %s3453_s10, %s3149_s16  ;;  %s3154_s12 = sshll.u32 %s3245_s17, 4  ;;  %s3155_s12 = int_to_ptr.vmem [resolvable:$false] %s3154_s12 }
  0x6b   : > { %s3156_s20 = scalar_lea.vmem %s3155_s12, 4096  ;;  %p3157_p12 = scmp.lt.s32.totalorder %s3453_s10, %s3155_s12 }
  0x6c   : > { %p3152_p3 = pnand %p3150_p10, %p3136_p9  ;;  %p3158_p1 = scmp.lt.s32.totalorder %s3156_s20, %s3149_s16 }
  0x6e   : > { %p3153_p7 = pneg %p3152_p3  ;;  %p3159_p2 = por %p3158_p1, %p3157_p12 }
  0x70   : > { %p3160_p4 = pnand %p3159_p2, %p3153_p7 }
  0x72   : > { %3163 = shalt.err (!%p3160_p4)
}
  0x73   : > { %2933 = dma.hbm_to_vmem [thread:$0]  (!%p3449_p11), %s3447_s26, 2048, %s3453_s10, %s3455_s8, %s3243_s30, %s3243_s30, %s3244_s9  }
  0x74   : > { %p3679_p9 = scmp.ne.s32.totalorder %s3673_s29, 0 }
  0x75   : > { %s3489_s13 = sand.u32 (!%p3679_p9), 1, %s3230_s22   ;;  %p3680_p0 = scmp.ne.s32.totalorder (!%p3679_p9), %s3671_s27, 0 }
  0x76   : > { %267 = sbr.rel (%p3679_p9) target bundleno = 1972 (0x7b4), region = 44  ;;  %s1931_s19 = sshll.u32 (!%p3679_p9), %s3489_s13, 7 }
  0x77   : > { %s270_s7 = scalar_lea.sflag (!%p3679_p9), [#allocation3], %s3489_s13  ;;  %s3495_s11 = scalar_lea.vmem (!%p3679_p9), [#allocation2], %s1931_s19 }
  0x7d   : > { %3209 = dma.done.wait (%p3680_p0), %s270_s7, 2048  }
  0x7e   : > { %3211 = vsyncadd (%p3680_p0), %s270_s7, 4294965248  ;;  %p3681_p11 = scmp.eq.s32.totalorder %s3305_s25, 0 }
  0x80   : > { %3213 = dma.done.wait (%p3681_p11), [#allocation6], 14336   ;;  %p3682_p8 = pmov %p3681_p11 }
  0x82   : > { %3215 = vsyncadd (%p3682_p8), [#allocation6], 4294952960  ;;  %p3683_p13 = pmov %p3682_p8 }
  0x83   : > { %p3684_p6 = pmov %p3682_p8 }
  0x84   : > { %3217 = dma.done.wait (%p3683_p13), [#allocation9], 2048  }
  0x85   : > { %3219 = vsyncadd (%p3684_p6), [#allocation9], 4294965248  ;;  %v333_v0 = vld [vmem:[#allocation5] sm:$0xff]  ;;  %v334_v1 = vld [vmem:[#allocation5 + $0x8] sm:$0xff]  ;;  %s3583_s8 = scalar_lea.vmem [#allocation10], %s1931_s19  ;;  %s1943_s16 = sshll.u32 %s3305_s25, 11 }
  0x86   : > { %v335_v2 = vld [vmem:[#allocation5 + $0x10] sm:$0xff]  ;;  %v2648_v3 = vpack.c.bf16 %v334_v1, %v333_v0  ;;  %v336_v4 = vld [vmem:[#allocation5 + $0x18] sm:$0xff]  ;;  %v337_v6 = vld [vmem:[#allocation5 + $0x20] sm:$0xff]  ;;  %s1819_s17 = sshll.u32 %s3583_s8, 4  ;;  %s3613_s19 = scalar_lea.hbm %s3667_s6, %s1943_s16  ;;  %s3615_s17 = int_to_ptr.vmem [resolvable:$true] %s1819_s17 }
  0x87   : > { %v2652_v5 = vpack.c.bf16 %v336_v4, %v335_v2  ;;  %v338_v7 = vld [vmem:[#allocation5 + $0x28] sm:$0xff]  ;;  %v317_v9 = vld [vmem:[%s3495_s11] sm:$0xff]  ;;  %v339_v10 = vld [vmem:[#allocation5 + $0x30] sm:$0xff]  ;;  %s1806_s7 = scalar_lea.sflag [#allocation4], %s3489_s13  ;;  %s3164_s25 = scalar_lea.vmem %s3615_s17, 2048 }
  0x88   : > { %2649 = vmatprep.subr.bf16.mxu0 %v2648_v3  ;;  %v2656_v8 = vpack.c.bf16 %v338_v7, %v337_v6  ;;  %v340_v11 = vld [vmem:[#allocation5 + $0x38] sm:$0xff]  ;;  %2232 = vmatprep.mubr.f32.mxu0 %v317_v9  ;;  %v341_v13 = vld [vmem:[#allocation5 + $0x40] sm:$0xff]  ;;  %v342_v14 = vld [vmem:[#allocation5 + $0x48] sm:$0xff]  ;;  %p3165_p10 = scmp.ne.s32.totalorder %s3615_s17, %s3164_s25 }
  0x89   : > { %2651 = vmatpush3.bf16.msra.mxu0 %v2648_v3  ;;  %v2660_v12 = vpack.c.bf16 %v340_v11, %v339_v10  ;;  %v514_v15 = vld [vmem:[#allocation7] sm:$0xff]  ;;  %v515_v16 = vld [vmem:[#allocation7 + $0x8] sm:$0xff]  ;;  %v516_v17 = vld [vmem:[#allocation7 + $0x10] sm:$0xff]  ;;  %v2664_v21 = vpack.c.bf16 %v342_v14, %v341_v13 }
  0x8a   : > { %2653 = vmatprep.subr.bf16.mxu0 %v2652_v5  ;;  %v517_v18 = vld [vmem:[#allocation7 + $0x18] sm:$0xff]  ;;  %v2680_v19 = vpack.c.bf16 %v515_v16, %v514_v15  ;;  %v518_v22 = vld [vmem:[#allocation7 + $0x20] sm:$0xff]  ;;  %v519_v23 = vld [vmem:[#allocation7 + $0x28] sm:$0xff]  ;;  %p3166_p3 = pnand %p3165_p10, %p3438_p5 }
  0x8b   : > { %v2684_v20 = vpack.c.bf16 %v517_v18, %v516_v17  ;;  %v343_v24 = vld [vmem:[#allocation5 + $0x50] sm:$0xff]  ;;  %v344_v25 = vld [vmem:[#allocation5 + $0x58] sm:$0xff]  ;;  %v2688_v26 = vpack.c.bf16 %v519_v23, %v518_v22  ;;  %v345_v30 = vld [vmem:[#allocation5 + $0x60] sm:$0xff] }
  0x8c   : > { %2681 = vmatprep.subr.bf16.mxu1 %v2680_v19  ;;  %v2668_v27 = vpack.c.bf16 %v344_v25, %v343_v24  ;;  %v520_v28 = vld [vmem:[#allocation7 + $0x30] sm:$0xff]  ;;  %v521_v29 = vld [vmem:[#allocation7 + $0x38] sm:$0xff]  ;;  %v346_v31 = vld [vmem:[#allocation5 + $0x68] sm:$0xff]  ;;  %p3167_p7 = pneg %p3166_p3 }
  0x8d   : > { %2655 = vmatpush3.bf16.msra.mxu0 %v2652_v5  ;;  %2683 = vmatpush3.bf16.msra.mxu1 %v2680_v19  ;;  %v2692_v32 = vpack.c.bf16 %v521_v29, %v520_v28  ;;  %v2672_v33 = vpack.c.bf16 %v346_v31, %v345_v30  ;;  %v522_v34 = vld [vmem:[#allocation7 + $0x40] sm:$0xff]  ;;  %v523_v35 = vld [vmem:[#allocation7 + $0x48] sm:$0xff]  ;;  %v347_v36 = vld [vmem:[#allocation5 + $0x70] sm:$0xff] }
  0x8e   : > { %2657 = vmatprep.subr.bf16.mxu0 %v2656_v8  ;;  %2685 = vmatprep.subr.bf16.mxu1 %v2684_v20  ;;  %v348_v37 = vld [vmem:[#allocation5 + $0x78] sm:$0xff]  ;;  %v2696_v38 = vpack.c.bf16 %v523_v35, %v522_v34  ;;  %v524_v40 = vld [vmem:[#allocation7 + $0x50] sm:$0xff]  ;;  %v526_v43 = vld [vmem:[#allocation7 + $0x60] sm:$0xff] }
  0x8f   : > { %v2676_v39 = vpack.c.bf16 %v348_v37, %v347_v36  ;;  %v525_v41 = vld [vmem:[#allocation7 + $0x58] sm:$0xff]  ;;  %v527_v44 = vld [vmem:[#allocation7 + $0x68] sm:$0xff]  ;;  %v319_v47 = vld [vmem:[%s3495_s11 + $0x10] sm:$0xff] }
  0x90   : > { %v2700_v42 = vpack.c.bf16 %v525_v41, %v524_v40  ;;  %v318_v45 = vld [vmem:[%s3495_s11 + $0x8] sm:$0xff]  ;;  %v2704_v46 = vpack.c.bf16 %v527_v44, %v526_v43  ;;  %v320_v48 = vld [vmem:[%s3495_s11 + $0x18] sm:$0xff]  ;;  %v321_v49 = vld [vmem:[%s3495_s11 + $0x20] sm:$0xff] }
  0x91   : > { %2659 = vmatpush3.bf16.msra.mxu0 %v2656_v8  ;;  %2687 = vmatpush3.bf16.msra.mxu1 %v2684_v20  ;;  %v322_v50 = vld [vmem:[%s3495_s11 + $0x28] sm:$0xff]  ;;  %v323_v51 = vld [vmem:[%s3495_s11 + $0x30] sm:$0xff]  ;;  %v324_v52 = vld [vmem:[%s3495_s11 + $0x38] sm:$0xff] }
  0x92   : > { %2661 = vmatprep.subr.bf16.mxu0 %v2660_v12  ;;  %2689 = vmatprep.subr.bf16.mxu1 %v2688_v26  ;;  %v325_v53 = vld [vmem:[%s3495_s11 + $0x40] sm:$0xff]  ;;  %v326_v54 = vld [vmem:[%s3495_s11 + $0x48] sm:$0xff]  ;;  %v327_v55 = vld [vmem:[%s3495_s11 + $0x50] sm:$0xff] }
  0x93   : > { %v328_v56 = vld [vmem:[%s3495_s11 + $0x58] sm:$0xff]  ;;  %v329_v57 = vld [vmem:[%s3495_s11 + $0x60] sm:$0xff]  ;;  %v330_v58 = vld [vmem:[%s3495_s11 + $0x68] sm:$0xff] }
  0x94   : > { %v331_v59 = vld [vmem:[%s3495_s11 + $0x70] sm:$0xff]  ;;  %v332_v60 = vld [vmem:[%s3495_s11 + $0x78] sm:$0xff]  ;;  %v696_v0 = vld [vmem:[#allocation7 + $0x80] sm:$0xff]  ;;  %s3246_s11 = smov [#allocation10]  }
  0x95   : > { %2663 = vmatpush3.bf16.msra.mxu0 %v2660_v12  ;;  %2691 = vmatpush3.bf16.msra.mxu1 %v2688_v26  ;;  %v528_v61 = vld [vmem:[#allocation7 + $0x70] sm:$0xff]  ;;  %v529_v62 = vld [vmem:[#allocation7 + $0x78] sm:$0xff]  ;;  %v697_v1 = vld [vmem:[#allocation7 + $0x88] sm:$0xff]  ;;  %s3168_s27 = sshll.u32 %s3246_s11, 4  ;;  %s3169_s27 = int_to_ptr.vmem [resolvable:$false] %s3168_s27 }
  0x96   : > { %2665 = vmatprep.subr.bf16.mxu0 %v2664_v21  ;;  %2693 = vmatprep.subr.bf16.mxu1 %v2692_v32  ;;  %v2708_v63 = vpack.c.bf16 %v529_v62, %v528_v61  ;;  %v698_v2 = vld [vmem:[#allocation7 + $0x90] sm:$0xff]  ;;  %v2712_v3 = vpack.c.bf16 %v697_v1, %v696_v0  ;;  %v699_v4 = vld [vmem:[#allocation7 + $0x98] sm:$0xff]  ;;  %v700_v6 = vld [vmem:[#allocation7 + $0xa0] sm:$0xff]  ;;  %s3170_s29 = scalar_lea.vmem %s3169_s27, 4096  ;;  %p3171_p12 = scmp.lt.s32.totalorder %s3615_s17, %s3169_s27 }
  0x97   : > { %v2716_v5 = vpack.c.bf16 %v699_v4, %v698_v2  ;;  %v701_v7 = vld [vmem:[#allocation7 + $0xa8] sm:$0xff]  ;;  %v702_v9 = vld [vmem:[#allocation7 + $0xb0] sm:$0xff]  ;;  %v703_v10 = vld [vmem:[#allocation7 + $0xb8] sm:$0xff]  ;;  %p3172_p1 = scmp.lt.s32.totalorder %s3170_s29, %s3164_s25 }
  0x98   : > { %v2720_v8 = vpack.c.bf16 %v701_v7, %v700_v6  ;;  %v2724_v11 = vpack.c.bf16 %v703_v10, %v702_v9  ;;  %v704_v12 = vld [vmem:[#allocation7 + $0xc0] sm:$0xff]  ;;  %v705_v13 = vld [vmem:[#allocation7 + $0xc8] sm:$0xff]  ;;  %v706_v15 = vld [vmem:[#allocation7 + $0xd0] sm:$0xff] }
  0x99   : > { %2667 = vmatpush3.bf16.msra.mxu0 %v2664_v21  ;;  %2695 = vmatpush3.bf16.msra.mxu1 %v2692_v32  ;;  %v2728_v14 = vpack.c.bf16 %v705_v13, %v704_v12  ;;  %v707_v16 = vld [vmem:[#allocation7 + $0xd8] sm:$0xff]  ;;  %v708_v18 = vld [vmem:[#allocation7 + $0xe0] sm:$0xff]  ;;  %v709_v19 = vld [vmem:[#allocation7 + $0xe8] sm:$0xff]  ;;  %v349_v21 = vlaneseq  ;;  %p3173_p2 = por %p3172_p1, %p3171_p12 }
  0x9a   : > { %2669 = vmatprep.subr.bf16.mxu0 %v2668_v27  ;;  %2697 = vmatprep.subr.bf16.mxu1 %v2696_v38  ;;  %v2732_v17 = vpack.c.bf16 %v707_v16, %v706_v15  ;;  %v2736_v20 = vpack.c.bf16 %v709_v19, %v708_v18  ;;  %v3531_v24 = vld [vmem:[%s3664_s3] sm:$0xff]  ;;  %v710_v10 = vld [vmem:[#allocation7 + $0xf0] sm:$0xff] }
  0x9b   : > { %v3525_v22 = vshrl.u32 %v349_v21, 7  ;;  %v878_v13 = vld [vmem:[#allocation7 + $0x100] sm:$0xff]  ;;  %v880_v15 = vld [vmem:[#allocation7 + $0x110] sm:$0xff]  ;;  %p3174_p4 = pnand %p3173_p2, %p3167_p7 }
  0x9c   : > { %v882_v19 = vld [vmem:[#allocation7 + $0x120] sm:$0xff] }
  0x9d   : > { %2671 = vmatpush3.bf16.msra.mxu0 %v2668_v27  ;;  %2699 = vmatpush3.bf16.msra.mxu1 %v2696_v38  ;;  %v351_v23 = vsub.s32 0, %v3525_v22 }
  0x9e   : > { %2673 = vmatprep.subr.bf16.mxu0 %v2672_v33  ;;  %2701 = vmatprep.subr.bf16.mxu1 %v2700_v42 }
  0x9f   : > { %v352_v25 = vrot.slane %v3531_v24, %v351_v23  ;;  %v884_v23 = vld [vmem:[#allocation7 + $0x130] sm:$0xff] }
  0xa1   : > { %2675 = vmatpush3.bf16.msra.mxu0 %v2672_v33  ;;  %2703 = vmatpush3.bf16.msra.mxu1 %v2700_v42 }
  0xa2   : > { %2677 = vmatprep.subr.bf16.mxu0 %v2676_v39  ;;  %2705 = vmatprep.subr.bf16.mxu1 %v2704_v46 }
  0xa5   : > { %2679 = vmatpush3.bf16.msra.mxu0 %v2676_v39  ;;  %2707 = vmatpush3.bf16.msra.mxu1 %v2704_v46 }
  0xa6   : > { %2709 = vmatprep.subr.bf16.mxu1 %v2708_v63  ;;  %2713 = vmatprep.subr.bf16.mxu0 %v2712_v3 }
  0xa8   : > { %2233 = vmatmul.mubr.f32.vlgmr.msra.gmra.mrb[0].mxu0 %v318_v45 }
  0xa9   : > { %2235 = vmatprep.mubr.f32.mxu0 %v319_v47  ;;  %2711 = vmatpush3.bf16.msra.mxu1 %v2708_v63 }
  0xaa   : > { %2715 = vmatpush3.bf16.msra.mxu0 %v2712_v3 }
  0xab   : > { %2717 = vmatprep.subr.bf16.mxu0 %v2716_v5 }
  0xac   : > { %2236 = vmatmul.mubr.f32.gmra.mrb[2].mxu0 %v320_v48 }
  0xad   : > { %2238 = vmatprep.mubr.f32.mxu0 %v321_v49 }
  0xae   : > { %2719 = vmatpush3.bf16.msra.mxu0 %v2716_v5 }
  0xaf   : > { %2721 = vmatprep.subr.bf16.mxu0 %v2720_v8 }
  0xb0   : > { %2239 = vmatmul.mubr.f32.gmra.mrb[4].mxu0 %v322_v50 }
  0xb1   : > { %2241 = vmatprep.mubr.f32.mxu0 %v323_v51 }
  0xb2   : > { %2723 = vmatpush3.bf16.msra.mxu0 %v2720_v8 }
  0xb3   : > { %2725 = vmatprep.subr.bf16.mxu0 %v2724_v11 }
  0xb4   : > { %2242 = vmatmul.mubr.f32.gmra.mrb[6].mxu0 %v324_v52 }
  0xb5   : > { %2244 = vmatprep.mubr.f32.mxu0 %v325_v53 }
  0xb6   : > { %2727 = vmatpush3.bf16.msra.mxu0 %v2724_v11  ;;  %v711_v11 = vld [vmem:[#allocation7 + $0xf8] sm:$0xff] }
  0xb7   : > { %2729 = vmatprep.subr.bf16.mxu0 %v2728_v14  ;;  %v2740_v12 = vpack.c.bf16 %v711_v11, %v710_v10 }
  0xb8   : > { %2245 = vmatmul.mubr.f32.gmra.mrb[8].mxu0 %v326_v54 }
  0xb9   : > { %2247 = vmatprep.mubr.f32.mxu0 %v327_v55 }
  0xba   : > { %2731 = vmatpush3.bf16.msra.mxu0 %v2728_v14  ;;  %v879_v14 = vld [vmem:[#allocation7 + $0x108] sm:$0xff] }
  0xbb   : > { %2733 = vmatprep.subr.bf16.mxu0 %v2732_v17  ;;  %v2744_v16 = vpack.c.bf16 %v879_v14, %v878_v13 }
  0xbc   : > { %2248 = vmatmul.mubr.f32.gmra.mrb[10].mxu0 %v328_v56 }
  0xbd   : > { %2250 = vmatprep.mubr.f32.mxu0 %v329_v57  ;;  %2745 = vmatprep.subr.bf16.mxu1 %v2744_v16 }
  0xbe   : > { %2735 = vmatpush3.bf16.msra.mxu0 %v2732_v17  ;;  %v881_v17 = vld [vmem:[#allocation7 + $0x118] sm:$0xff] }
  0xbf   : > { %2737 = vmatprep.subr.bf16.mxu0 %v2736_v20  ;;  %v2748_v18 = vpack.c.bf16 %v881_v17, %v880_v15 }
  0xc0   : > { %2251 = vmatmul.mubr.f32.gmra.mrb[12].mxu0 %v330_v58 }
  0xc1   : > { %2253 = vmatprep.mubr.f32.mxu0 %v331_v59 }
  0xc2   : > { %2739 = vmatpush3.bf16.msra.mxu0 %v2736_v20  ;;  %v883_v20 = vld [vmem:[#allocation7 + $0x128] sm:$0xff] }
  0xc3   : > { %2741 = vmatprep.subr.bf16.mxu0 %v2740_v12  ;;  %v2752_v21 = vpack.c.bf16 %v883_v20, %v882_v19 }
  0xc4   : > { %2254 = vmatmul.mubr.f32.gmra.mrb[14].mxu0 %v332_v60 }
  0xc6   : > { %2743 = vmatpush3.bf16.msra.mxu0 %v2740_v12 }
 0x17b   : > { %v2234_v26 = vpop.f32.mrb[0].mxu0 }
 0x17c   : > { %v425_v27 = vadd.f32 %v2234_v26, %v352_v25  ;;  %v419_v28 = vpop.f32.mrb[1].mxu0 }
 0x17d   : > { %v420_v29 = vadd.f32 %v419_v28, %v352_v25  ;;  %v887_v28 = vld [vmem:[#allocation7 + $0x148] sm:$0xff] }
 0x17e   : > { %v499_v32 = vmax.f32 %v425_v27, 0.0  ;;  %v886_v27 = vld [vmem:[#allocation7 + $0x140] sm:$0xff] }
 0x17f   : > { %v2237_v30 = vpop.f32.mrb[2].mxu0  ;;  %v498_v31 = vmax.f32 %v420_v29, 0.0  ;;  %v2760_v29 = vpack.c.bf16 %v887_v28, %v886_v27  ;;  %v1060_v27 = vld [vmem:[#allocation7 + $0x180] sm:$0xff]  ;;  %v1061_v28 = vld [vmem:[#allocation7 + $0x188] sm:$0xff] }
 0x180   : > { %v435_v33 = vadd.f32 %v2237_v30, %v352_v25  ;;  %v429_v34 = vpop.f32.mrb[3].mxu0  ;;  %v888_v30 = vld [vmem:[#allocation7 + $0x150] sm:$0xff] }
 0x181   : > { %v430_v35 = vadd.f32 %v429_v34, %v352_v25  ;;  %2288 = vmatprep.mubr.f32.mxu1 %v498_v31  ;;  %v889_v31 = vld [vmem:[#allocation7 + $0x158] sm:$0xff]  ;;  %v891_v34 = vld [vmem:[#allocation7 + $0x168] sm:$0xff] }
 0x182   : > { %2289 = vmatmul.mubr.f32.vlgmr.msra.gmra.mrb[0].mxu1 %v499_v32  ;;  %v501_v38 = vmax.f32 %v435_v33, 0.0  ;;  %v2764_v32 = vpack.c.bf16 %v889_v31, %v888_v30  ;;  %v890_v33 = vld [vmem:[#allocation7 + $0x160] sm:$0xff]  ;;  %v2776_v30 = vpack.c.bf16 %v1061_v28, %v1060_v27  ;;  %v1063_v31 = vld [vmem:[#allocation7 + $0x198] sm:$0xff] }
 0x183   : > { %v500_v36 = vmax.f32 %v430_v35, 0.0  ;;  %v2240_v37 = vpop.f32.mrb[4].mxu0  ;;  %2747 = vmatpush3.bf16.msra.mxu1 %v2744_v16  ;;  %v2768_v35 = vpack.c.bf16 %v891_v34, %v890_v33  ;;  %v1064_v33 = vld [vmem:[#allocation7 + $0x1a0] sm:$0xff]  ;;  %v1065_v34 = vld [vmem:[#allocation7 + $0x1a8] sm:$0xff] }
 0x184   : > { %v445_v39 = vadd.f32 %v2240_v37, %v352_v25  ;;  %v439_v40 = vpop.f32.mrb[5].mxu0  ;;  %2749 = vmatprep.subr.bf16.mxu1 %v2748_v18  ;;  %2777 = vmatprep.subr.bf16.mxu0 %v2776_v30 }
 0x185   : > { %v440_v41 = vadd.f32 %v439_v40, %v352_v25  ;;  %2291 = vmatprep.mubr.f32.mxu1 %v500_v36  ;;  %v532_v36 = vsub.s32 1, %v3525_v22 }
 0x186   : > { %2292 = vmatmul.mubr.f32.gmra.mrb[2].mxu1 %v501_v38  ;;  %v503_v44 = vmax.f32 %v445_v39, 0.0 }
 0x187   : > { %v502_v42 = vmax.f32 %v440_v41, 0.0  ;;  %v2243_v43 = vpop.f32.mrb[6].mxu0  ;;  %2751 = vmatpush3.bf16.msra.mxu1 %v2748_v18  ;;  %v533_v37 = vrot.slane %v3531_v24, %v532_v36  ;;  %v1066_v36 = vld [vmem:[#allocation7 + $0x1b0] sm:$0xff] }
 0x188   : > { %v455_v45 = vadd.f32 %v2243_v43, %v352_v25  ;;  %v449_v46 = vpop.f32.mrb[7].mxu0  ;;  %2753 = vmatprep.subr.bf16.mxu1 %v2752_v21 }
 0x189   : > { %v450_v47 = vadd.f32 %v449_v46, %v352_v25  ;;  %2294 = vmatprep.mubr.f32.mxu1 %v502_v42 }
 0x18a   : > { %2295 = vmatmul.mubr.f32.gmra.mrb[4].mxu1 %v503_v44  ;;  %v505_v50 = vmax.f32 %v455_v45, 0.0 }
 0x18b   : > { %v504_v48 = vmax.f32 %v450_v47, 0.0  ;;  %v2246_v49 = vpop.f32.mrb[8].mxu0  ;;  %2755 = vmatpush3.bf16.msra.mxu1 %v2752_v21 }
 0x18c   : > { %v465_v51 = vadd.f32 %v2246_v49, %v352_v25  ;;  %v459_v52 = vpop.f32.mrb[9].mxu0 }
 0x18d   : > { %v460_v53 = vadd.f32 %v459_v52, %v352_v25  ;;  %2297 = vmatprep.mubr.f32.mxu1 %v504_v48 }
 0x18e   : > { %2298 = vmatmul.mubr.f32.gmra.mrb[6].mxu1 %v505_v50  ;;  %v507_v56 = vmax.f32 %v465_v51, 0.0 }
 0x18f   : > { %v506_v54 = vmax.f32 %v460_v53, 0.0  ;;  %v2249_v55 = vpop.f32.mrb[10].mxu0 }
 0x190   : > { %v475_v57 = vadd.f32 %v2249_v55, %v352_v25  ;;  %v469_v58 = vpop.f32.mrb[11].mxu0 }
 0x191   : > { %v470_v59 = vadd.f32 %v469_v58, %v352_v25  ;;  %2300 = vmatprep.mubr.f32.mxu1 %v506_v54 }
 0x192   : > { %2301 = vmatmul.mubr.f32.gmra.mrb[8].mxu1 %v507_v56  ;;  %v509_v62 = vmax.f32 %v475_v57, 0.0 }
 0x193   : > { %v508_v60 = vmax.f32 %v470_v59, 0.0  ;;  %v2252_v61 = vpop.f32.mrb[12].mxu0 }
 0x194   : > { %v485_v63 = vadd.f32 %v2252_v61, %v352_v25  ;;  %v479_v0 = vpop.f32.mrb[13].mxu0 }
 0x195   : > { %v480_v1 = vadd.f32 %v479_v0, %v352_v25  ;;  %2303 = vmatprep.mubr.f32.mxu1 %v508_v60 }
 0x196   : > { %2304 = vmatmul.mubr.f32.gmra.mrb[10].mxu1 %v509_v62  ;;  %v511_v4 = vmax.f32 %v485_v63, 0.0 }
 0x197   : > { %v510_v2 = vmax.f32 %v480_v1, 0.0  ;;  %v2255_v3 = vpop.f32.mrb[14].mxu0 }
 0x198   : > { %v495_v5 = vadd.f32 %v2255_v3, %v352_v25  ;;  %v489_v6 = vpop.f32.mrb[15].mxu0 }
 0x199   : > { %v490_v7 = vadd.f32 %v489_v6, %v352_v25  ;;  %2306 = vmatprep.mubr.f32.mxu1 %v510_v2  ;;  %v885_v25 = vld [vmem:[#allocation7 + $0x138] sm:$0xff] }
 0x19a   : > { %2307 = vmatmul.mubr.f32.gmra.mrb[12].mxu1 %v511_v4  ;;  %v513_v9 = vmax.f32 %v495_v5, 0.0  ;;  %v2756_v26 = vpack.c.bf16 %v885_v25, %v884_v23  ;;  %v892_v23 = vld [vmem:[#allocation7 + $0x170] sm:$0xff]  ;;  %v893_v25 = vld [vmem:[#allocation7 + $0x178] sm:$0xff] }
 0x19b   : > { %v512_v8 = vmax.f32 %v490_v7, 0.0 }
 0x19c   : > { %2757 = vmatprep.subr.bf16.mxu1 %v2756_v26 }
 0x19d   : > { %2309 = vmatprep.mubr.f32.mxu1 %v512_v8  ;;  %2759 = vmatpush3.bf16.msra.mxu1 %v2756_v26  ;;  %v2772_v26 = vpack.c.bf16 %v893_v25, %v892_v23 }
 0x19e   : > { %2310 = vmatmul.mubr.f32.gmra.mrb[14].mxu1 %v513_v9  ;;  %2761 = vmatprep.subr.bf16.mxu1 %v2760_v29 }
 0x1a1   : > { %2763 = vmatpush3.bf16.msra.mxu1 %v2760_v29  ;;  %v1062_v29 = vld [vmem:[#allocation7 + $0x190] sm:$0xff] }
 0x1a2   : > { %2765 = vmatprep.subr.bf16.mxu1 %v2764_v32 }
 0x1a5   : > { %2767 = vmatpush3.bf16.msra.mxu1 %v2764_v32  ;;  %v2780_v32 = vpack.c.bf16 %v1063_v31, %v1062_v29  ;;  %v1071_v31 = vld [vmem:[#allocation7 + $0x1d8] sm:$0xff] }
 0x1a6   : > { %2769 = vmatprep.subr.bf16.mxu1 %v2768_v35 }
 0x1a9   : > { %2771 = vmatpush3.bf16.msra.mxu1 %v2768_v35  ;;  %v2784_v35 = vpack.c.bf16 %v1065_v34, %v1064_v33  ;;  %v1072_v33 = vld [vmem:[#allocation7 + $0x1e0] sm:$0xff]  ;;  %v1073_v34 = vld [vmem:[#allocation7 + $0x1e8] sm:$0xff] }
 0x1aa   : > { %2773 = vmatprep.subr.bf16.mxu1 %v2772_v26 }
 0x1ad   : > { %2775 = vmatpush3.bf16.msra.mxu1 %v2772_v26 }
 0x255   : > { %v2290_v38 = vpop.f32.mrb[0].mxu1 }
 0x256   : > { %v606_v39 = vadd.f32 %v2290_v38, %v533_v37  ;;  %v600_v40 = vpop.f32.mrb[1].mxu1 }
 0x257   : > { %v601_v41 = vadd.f32 %v600_v40, %v533_v37  ;;  %v1069_v40 = vld [vmem:[#allocation7 + $0x1c8] sm:$0xff] }
 0x258   : > { %v680_v44 = vmax.f32 %v606_v39, 0.0  ;;  %v1068_v39 = vld [vmem:[#allocation7 + $0x1c0] sm:$0xff] }
 0x259   : > { %v679_v42 = vmax.f32 %v601_v41, 0.0  ;;  %v2293_v43 = vpop.f32.mrb[2].mxu1  ;;  %v2792_v41 = vpack.c.bf16 %v1069_v40, %v1068_v39  ;;  %v1242_v39 = vld [vmem:[#allocation7 + $0x200] sm:$0xff]  ;;  %v1243_v40 = vld [vmem:[#allocation7 + $0x208] sm:$0xff] }
 0x25a   : > { %v616_v45 = vadd.f32 %v2293_v43, %v533_v37  ;;  %v610_v46 = vpop.f32.mrb[3].mxu1 }
 0x25b   : > { %v611_v47 = vadd.f32 %v610_v46, %v533_v37  ;;  %2344 = vmatprep.mubr.f32.mxu0 %v679_v42  ;;  %v714_v42 = vsub.s32 2, %v3525_v22 }
 0x25c   : > { %2345 = vmatmul.mubr.f32.vlgmr.msra.gmra.mrb[16].mxu0 %v680_v44  ;;  %v682_v50 = vmax.f32 %v616_v45, 0.0 }
 0x25d   : > { %v681_v48 = vmax.f32 %v611_v47, 0.0  ;;  %v2296_v49 = vpop.f32.mrb[4].mxu1  ;;  %2779 = vmatpush3.bf16.msra.mxu0 %v2776_v30  ;;  %v715_v43 = vrot.slane %v3531_v24, %v714_v42  ;;  %v1070_v30 = vld [vmem:[#allocation7 + $0x1d0] sm:$0xff]  ;;  %v2808_v42 = vpack.c.bf16 %v1243_v40, %v1242_v39 }
 0x25e   : > { %v626_v51 = vadd.f32 %v2296_v49, %v533_v37  ;;  %v620_v52 = vpop.f32.mrb[5].mxu1  ;;  %2781 = vmatprep.subr.bf16.mxu0 %v2780_v32 }
 0x25f   : > { %v621_v53 = vadd.f32 %v620_v52, %v533_v37  ;;  %2347 = vmatprep.mubr.f32.mxu0 %v681_v48  ;;  %2809 = vmatprep.subr.bf16.mxu1 %v2808_v42 }
 0x260   : > { %2348 = vmatmul.mubr.f32.gmra.mrb[18].mxu0 %v682_v50  ;;  %v684_v56 = vmax.f32 %v626_v51, 0.0 }
 0x261   : > { %v683_v54 = vmax.f32 %v621_v53, 0.0  ;;  %v2299_v55 = vpop.f32.mrb[6].mxu1  ;;  %2783 = vmatpush3.bf16.msra.mxu0 %v2780_v32  ;;  %v2796_v32 = vpack.c.bf16 %v1071_v31, %v1070_v30 }
 0x262   : > { %v636_v57 = vadd.f32 %v2299_v55, %v533_v37  ;;  %v630_v58 = vpop.f32.mrb[7].mxu1  ;;  %2785 = vmatprep.subr.bf16.mxu0 %v2784_v35 }
 0x263   : > { %v631_v59 = vadd.f32 %v630_v58, %v533_v37  ;;  %2350 = vmatprep.mubr.f32.mxu0 %v683_v54 }
 0x264   : > { %2351 = vmatmul.mubr.f32.gmra.mrb[20].mxu0 %v684_v56  ;;  %v686_v62 = vmax.f32 %v636_v57, 0.0 }
 0x265   : > { %v685_v60 = vmax.f32 %v631_v59, 0.0  ;;  %v2302_v61 = vpop.f32.mrb[8].mxu1  ;;  %2787 = vmatpush3.bf16.msra.mxu0 %v2784_v35  ;;  %v2800_v35 = vpack.c.bf16 %v1073_v34, %v1072_v33 }
 0x266   : > { %v646_v63 = vadd.f32 %v2302_v61, %v533_v37  ;;  %v640_v0 = vpop.f32.mrb[9].mxu1 }
 0x267   : > { %v641_v1 = vadd.f32 %v640_v0, %v533_v37  ;;  %2353 = vmatprep.mubr.f32.mxu0 %v685_v60 }
 0x268   : > { %2354 = vmatmul.mubr.f32.gmra.mrb[22].mxu0 %v686_v62  ;;  %v688_v4 = vmax.f32 %v646_v63, 0.0 }
 0x269   : > { %v687_v2 = vmax.f32 %v641_v1, 0.0  ;;  %v2305_v3 = vpop.f32.mrb[10].mxu1 }
 0x26a   : > { %v656_v5 = vadd.f32 %v2305_v3, %v533_v37  ;;  %v650_v6 = vpop.f32.mrb[11].mxu1 }
 0x26b   : > { %v651_v7 = vadd.f32 %v650_v6, %v533_v37  ;;  %2356 = vmatprep.mubr.f32.mxu0 %v687_v2 }
 0x26c   : > { %2357 = vmatmul.mubr.f32.gmra.mrb[24].mxu0 %v688_v4  ;;  %v690_v10 = vmax.f32 %v656_v5, 0.0 }
 0x26d   : > { %v689_v8 = vmax.f32 %v651_v7, 0.0  ;;  %v2308_v9 = vpop.f32.mrb[12].mxu1 }
 0x26e   : > { %v666_v11 = vadd.f32 %v2308_v9, %v533_v37  ;;  %v660_v12 = vpop.f32.mrb[13].mxu1 }
 0x26f   : > { %v661_v13 = vadd.f32 %v660_v12, %v533_v37  ;;  %2359 = vmatprep.mubr.f32.mxu0 %v689_v8 }
 0x270   : > { %2360 = vmatmul.mubr.f32.gmra.mrb[26].mxu0 %v690_v10  ;;  %v692_v16 = vmax.f32 %v666_v11, 0.0 }
 0x271   : > { %v691_v14 = vmax.f32 %v661_v13, 0.0  ;;  %v2311_v15 = vpop.f32.mrb[14].mxu1 }
 0x272   : > { %v676_v17 = vadd.f32 %v2311_v15, %v533_v37  ;;  %v670_v18 = vpop.f32.mrb[15].mxu1 }
 0x273   : > { %v671_v19 = vadd.f32 %v670_v18, %v533_v37  ;;  %2362 = vmatprep.mubr.f32.mxu0 %v691_v14  ;;  %v1067_v37 = vld [vmem:[#allocation7 + $0x1b8] sm:$0xff] }
 0x274   : > { %2363 = vmatmul.mubr.f32.gmra.mrb[28].mxu0 %v692_v16  ;;  %v694_v21 = vmax.f32 %v676_v17, 0.0  ;;  %v2788_v38 = vpack.c.bf16 %v1067_v37, %v1066_v36  ;;  %v1074_v36 = vld [vmem:[#allocation7 + $0x1f0] sm:$0xff]  ;;  %v1075_v37 = vld [vmem:[#allocation7 + $0x1f8] sm:$0xff] }
 0x275   : > { %v693_v20 = vmax.f32 %v671_v19, 0.0 }
 0x276   : > { %2789 = vmatprep.subr.bf16.mxu0 %v2788_v38 }
 0x277   : > { %2365 = vmatprep.mubr.f32.mxu0 %v693_v20  ;;  %2791 = vmatpush3.bf16.msra.mxu0 %v2788_v38  ;;  %v2804_v38 = vpack.c.bf16 %v1075_v37, %v1074_v36 }
 0x278   : > { %2366 = vmatmul.mubr.f32.gmra.mrb[30].mxu0 %v694_v21  ;;  %2793 = vmatprep.subr.bf16.mxu0 %v2792_v41 }
 0x27b   : > { %2795 = vmatpush3.bf16.msra.mxu0 %v2792_v41  ;;  %v1244_v41 = vld [vmem:[#allocation7 + $0x210] sm:$0xff] }
 0x27c   : > { %2797 = vmatprep.subr.bf16.mxu0 %v2796_v32 }
 0x27f   : > { %2799 = vmatpush3.bf16.msra.mxu0 %v2796_v32 }
 0x280   : > { %2801 = vmatprep.subr.bf16.mxu0 %v2800_v35 }
 0x283   : > { %2803 = vmatpush3.bf16.msra.mxu0 %v2800_v35 }
 0x284   : > { %2805 = vmatprep.subr.bf16.mxu0 %v2804_v38 }
 0x287   : > { %2807 = vmatpush3.bf16.msra.mxu0 %v2804_v38 }
 0x32f   : > { %v2346_v44 = vpop.f32.mrb[16].mxu0 }
 0x330   : > { %v788_v45 = vadd.f32 %v2346_v44, %v715_v43  ;;  %v782_v46 = vpop.f32.mrb[17].mxu0 }
 0x331   : > { %v783_v47 = vadd.f32 %v782_v46, %v715_v43  ;;  %v1247_v46 = vld [vmem:[#allocation7 + $0x228] sm:$0xff] }
 0x332   : > { %v862_v50 = vmax.f32 %v788_v45, 0.0  ;;  %v1246_v45 = vld [vmem:[#allocation7 + $0x220] sm:$0xff] }
 0x333   : > { %v861_v48 = vmax.f32 %v783_v47, 0.0  ;;  %v2349_v49 = vpop.f32.mrb[18].mxu0  ;;  %v2816_v47 = vpack.c.bf16 %v1247_v46, %v1246_v45 }
 0x334   : > { %v798_v51 = vadd.f32 %v2349_v49, %v715_v43  ;;  %v792_v52 = vpop.f32.mrb[19].mxu0  ;;  %v1249_v49 = vld [vmem:[#allocation7 + $0x238] sm:$0xff] }
 0x335   : > { %v793_v53 = vadd.f32 %v792_v52, %v715_v43  ;;  %2400 = vmatprep.mubr.f32.mxu1 %v861_v48  ;;  %v1248_v48 = vld [vmem:[#allocation7 + $0x230] sm:$0xff]  ;;  %v1251_v52 = vld [vmem:[#allocation7 + $0x248] sm:$0xff] }
 0x336   : > { %2401 = vmatmul.mubr.f32.vlgmr.msra.gmra.mrb[16].mxu1 %v862_v50  ;;  %v864_v56 = vmax.f32 %v798_v51, 0.0  ;;  %v2820_v50 = vpack.c.bf16 %v1249_v49, %v1248_v48  ;;  %v1250_v51 = vld [vmem:[#allocation7 + $0x240] sm:$0xff]  ;;  %v1256_v48 = vld [vmem:[#allocation7 + $0x270] sm:$0xff]  ;;  %v1257_v49 = vld [vmem:[#allocation7 + $0x278] sm:$0xff] }
 0x337   : > { %v863_v54 = vmax.f32 %v793_v53, 0.0  ;;  %v2352_v55 = vpop.f32.mrb[20].mxu0  ;;  %2811 = vmatpush3.bf16.msra.mxu1 %v2808_v42  ;;  %v2824_v53 = vpack.c.bf16 %v1251_v52, %v1250_v51  ;;  %v1424_v51 = vld [vmem:[#allocation7 + $0x280] sm:$0xff]  ;;  %v1425_v52 = vld [vmem:[#allocation7 + $0x288] sm:$0xff] }
 0x338   : > { %v808_v57 = vadd.f32 %v2352_v55, %v715_v43  ;;  %v802_v58 = vpop.f32.mrb[21].mxu0  ;;  %v1253_v55 = vld [vmem:[#allocation7 + $0x258] sm:$0xff] }
 0x339   : > { %v803_v59 = vadd.f32 %v802_v58, %v715_v43  ;;  %2403 = vmatprep.mubr.f32.mxu1 %v863_v54  ;;  %v1252_v54 = vld [vmem:[#allocation7 + $0x250] sm:$0xff]  ;;  %v1255_v58 = vld [vmem:[#allocation7 + $0x268] sm:$0xff] }
 0x33a   : > { %2404 = vmatmul.mubr.f32.gmra.mrb[18].mxu1 %v864_v56  ;;  %v866_v62 = vmax.f32 %v808_v57, 0.0  ;;  %v2828_v56 = vpack.c.bf16 %v1253_v55, %v1252_v54  ;;  %v1254_v57 = vld [vmem:[#allocation7 + $0x260] sm:$0xff]  ;;  %v2840_v54 = vpack.c.bf16 %v1425_v52, %v1424_v51  ;;  %v1427_v55 = vld [vmem:[#allocation7 + $0x298] sm:$0xff] }
 0x33b   : > { %v865_v60 = vmax.f32 %v803_v59, 0.0  ;;  %v2355_v61 = vpop.f32.mrb[22].mxu0  ;;  %v2832_v59 = vpack.c.bf16 %v1255_v58, %v1254_v57  ;;  %v1428_v57 = vld [vmem:[#allocation7 + $0x2a0] sm:$0xff]  ;;  %v1429_v58 = vld [vmem:[#allocation7 + $0x2a8] sm:$0xff] }
 0x33c   : > { %v818_v63 = vadd.f32 %v2355_v61, %v715_v43  ;;  %v812_v0 = vpop.f32.mrb[23].mxu0  ;;  %2841 = vmatprep.subr.bf16.mxu0 %v2840_v54 }
 0x33d   : > { %v813_v1 = vadd.f32 %v812_v0, %v715_v43  ;;  %2406 = vmatprep.mubr.f32.mxu1 %v865_v60  ;;  %v896_v60 = vsub.s32 3, %v3525_v22 }
 0x33e   : > { %2407 = vmatmul.mubr.f32.gmra.mrb[20].mxu1 %v866_v62  ;;  %v868_v4 = vmax.f32 %v818_v63, 0.0 }
 0x33f   : > { %v867_v2 = vmax.f32 %v813_v1, 0.0  ;;  %v2358_v3 = vpop.f32.mrb[24].mxu0  ;;  %v3540_v61 = vrot.slane %v3531_v24, %v896_v60  ;;  %v1430_v60 = vld [vmem:[#allocation7 + $0x2b0] sm:$0xff] }
 0x340   : > { %v828_v5 = vadd.f32 %v2358_v3, %v715_v43  ;;  %v822_v6 = vpop.f32.mrb[25].mxu0 }
 0x341   : > { %v823_v7 = vadd.f32 %v822_v6, %v715_v43  ;;  %2409 = vmatprep.mubr.f32.mxu1 %v867_v2 }
 0x342   : > { %2410 = vmatmul.mubr.f32.gmra.mrb[22].mxu1 %v868_v4  ;;  %v870_v10 = vmax.f32 %v828_v5, 0.0 }
 0x343   : > { %v869_v8 = vmax.f32 %v823_v7, 0.0  ;;  %v2361_v9 = vpop.f32.mrb[26].mxu0 }
 0x344   : > { %v838_v11 = vadd.f32 %v2361_v9, %v715_v43  ;;  %v832_v12 = vpop.f32.mrb[27].mxu0 }
 0x345   : > { %v833_v13 = vadd.f32 %v832_v12, %v715_v43  ;;  %2412 = vmatprep.mubr.f32.mxu1 %v869_v8 }
 0x346   : > { %2413 = vmatmul.mubr.f32.gmra.mrb[24].mxu1 %v870_v10  ;;  %v872_v16 = vmax.f32 %v838_v11, 0.0 }
 0x347   : > { %v871_v14 = vmax.f32 %v833_v13, 0.0  ;;  %v2364_v15 = vpop.f32.mrb[28].mxu0 }
 0x348   : > { %v848_v17 = vadd.f32 %v2364_v15, %v715_v43  ;;  %v842_v18 = vpop.f32.mrb[29].mxu0 }
 0x349   : > { %v843_v19 = vadd.f32 %v842_v18, %v715_v43  ;;  %2415 = vmatprep.mubr.f32.mxu1 %v871_v14 }
 0x34a   : > { %2416 = vmatmul.mubr.f32.gmra.mrb[26].mxu1 %v872_v16  ;;  %v874_v23 = vmax.f32 %v848_v17, 0.0 }
 0x34b   : > { %v873_v20 = vmax.f32 %v843_v19, 0.0  ;;  %v2367_v21 = vpop.f32.mrb[30].mxu0 }
 0x34c   : > { %v858_v25 = vadd.f32 %v2367_v21, %v715_v43  ;;  %v852_v26 = vpop.f32.mrb[31].mxu0 }
 0x34d   : > { %v853_v27 = vadd.f32 %v852_v26, %v715_v43  ;;  %2418 = vmatprep.mubr.f32.mxu1 %v873_v20  ;;  %v1245_v43 = vld [vmem:[#allocation7 + $0x218] sm:$0xff] }
 0x34e   : > { %2419 = vmatmul.mubr.f32.gmra.mrb[28].mxu1 %v874_v23  ;;  %v876_v29 = vmax.f32 %v858_v25, 0.0  ;;  %v2812_v44 = vpack.c.bf16 %v1245_v43, %v1244_v41 }
 0x34f   : > { %v875_v28 = vmax.f32 %v853_v27, 0.0 }
 0x350   : > { %2813 = vmatprep.subr.bf16.mxu1 %v2812_v44 }
 0x351   : > { %2421 = vmatprep.mubr.f32.mxu1 %v875_v28  ;;  %2815 = vmatpush3.bf16.msra.mxu1 %v2812_v44 }
 0x352   : > { %2422 = vmatmul.mubr.f32.gmra.mrb[30].mxu1 %v876_v29  ;;  %2817 = vmatprep.subr.bf16.mxu1 %v2816_v47 }
 0x355   : > { %2819 = vmatpush3.bf16.msra.mxu1 %v2816_v47 }
 0x356   : > { %2821 = vmatprep.subr.bf16.mxu1 %v2820_v50 }
 0x359   : > { %2823 = vmatpush3.bf16.msra.mxu1 %v2820_v50  ;;  %v2836_v50 = vpack.c.bf16 %v1257_v49, %v1256_v48 }
 0x35a   : > { %2825 = vmatprep.subr.bf16.mxu1 %v2824_v53 }
 0x35d   : > { %2827 = vmatpush3.bf16.msra.mxu1 %v2824_v53  ;;  %v1426_v53 = vld [vmem:[#allocation7 + $0x290] sm:$0xff] }
 0x35e   : > { %2829 = vmatprep.subr.bf16.mxu1 %v2828_v56 }
 0x361   : > { %2831 = vmatpush3.bf16.msra.mxu1 %v2828_v56  ;;  %v2844_v56 = vpack.c.bf16 %v1427_v55, %v1426_v53 }
 0x362   : > { %2833 = vmatprep.subr.bf16.mxu1 %v2832_v59 }
 0x365   : > { %2835 = vmatpush3.bf16.msra.mxu1 %v2832_v59  ;;  %v2848_v59 = vpack.c.bf16 %v1429_v58, %v1428_v57 }
 0x366   : > { %2837 = vmatprep.subr.bf16.mxu1 %v2836_v50 }
 0x369   : > { %2839 = vmatpush3.bf16.msra.mxu1 %v2836_v50 }
 0x409   : > { %v2402_v62 = vpop.f32.mrb[16].mxu1 }
 0x40a   : > { %v970_v63 = vadd.f32 %v2402_v62, %v3540_v61  ;;  %v964_v0 = vpop.f32.mrb[17].mxu1 }
 0x40b   : > { %v965_v1 = vadd.f32 %v964_v0, %v3540_v61  ;;  %v1433_v0 = vld [vmem:[#allocation7 + $0x2c8] sm:$0xff] }
 0x40d   : > { %2985 = vtanh.f32 %v965_v1  ;;  %v2405_v2 = vpop.f32.mrb[18].mxu1 }
 0x40e   : > { %2987 = vtanh.f32 %v970_v63  ;;  %v980_v3 = vadd.f32 %v2405_v2, %v3540_v61  ;;  %v974_v4 = vpop.f32.mrb[19].mxu1  ;;  %v1432_v63 = vld [vmem:[#allocation7 + $0x2c0] sm:$0xff]  ;;  %v1434_v2 = vld [vmem:[#allocation7 + $0x2d0] sm:$0xff] }
 0x40f   : > { %v975_v5 = vadd.f32 %v974_v4, %v3540_v61  ;;  %v2856_v1 = vpack.c.bf16 %v1433_v0, %v1432_v63  ;;  %v1606_v63 = vld [vmem:[#allocation8 + $0x8] sm:$0xff]  ;;  %v1607_v0 = vld [vmem:[#allocation8 + $0x10] sm:$0xff] }
 0x411   : > { %2989 = vtanh.f32 %v975_v5  ;;  %v2408_v6 = vpop.f32.mrb[20].mxu1  ;;  %v1436_v5 = vld [vmem:[#allocation7 + $0x2e0] sm:$0xff] }
 0x412   : > { %2991 = vtanh.f32 %v980_v3  ;;  %v990_v7 = vadd.f32 %v2408_v6, %v3540_v61  ;;  %v984_v8 = vpop.f32.mrb[21].mxu1  ;;  %v1435_v3 = vld [vmem:[#allocation7 + $0x2d8] sm:$0xff]  ;;  %v1437_v6 = vld [vmem:[#allocation7 + $0x2e8] sm:$0xff] }
 0x413   : > { %v985_v9 = vadd.f32 %v984_v8, %v3540_v61  ;;  %v2860_v4 = vpack.c.bf16 %v1435_v3, %v1434_v2  ;;  %v1078_v8 = vsub.s32 4, %v3525_v22  ;;  %v1608_v2 = vld [vmem:[#allocation8 + $0x18] sm:$0xff] }
 0x414   : > { %v2876_v3 = vpack.c.bf16 %v1608_v2, %v1607_v0 }
 0x415   : > { %2993 = vtanh.f32 %v985_v9  ;;  %v2411_v10 = vpop.f32.mrb[22].mxu1  ;;  %v1079_v9 = vrot.slane %v3531_v24, %v1078_v8  ;;  %v1612_v8 = vld [vmem:[#allocation8 + $0x38] sm:$0xff] }
 0x416   : > { %2995 = vtanh.f32 %v990_v7  ;;  %v1000_v11 = vadd.f32 %v2411_v10, %v3540_v61  ;;  %v994_v12 = vpop.f32.mrb[23].mxu1  ;;  %v2864_v7 = vpack.c.bf16 %v1437_v6, %v1436_v5  ;;  %v1610_v5 = vld [vmem:[#allocation8 + $0x28] sm:$0xff] }
 0x417   : > { %v2986_v13 = vpop.eup %2985  ;;  %v995_v14 = vadd.f32 %v994_v12, %v3540_v61 }
 0x418   : > { %v2988_v15 = vpop.eup %2987  ;;  %2456 = vmatprep.mubr.f32.mxu0 %v2986_v13 }
 0x419   : > { %2997 = vtanh.f32 %v995_v14  ;;  %v2414_v16 = vpop.f32.mrb[24].mxu1  ;;  %2457 = vmatmul.mubr.f32.vlgmr.msra.gmra.mrb[32].mxu0 %v2988_v15 }
 0x41a   : > { %2999 = vtanh.f32 %v1000_v11  ;;  %v1010_v17 = vadd.f32 %v2414_v16, %v3540_v61  ;;  %v1004_v18 = vpop.f32.mrb[25].mxu1  ;;  %2843 = vmatpush3.bf16.msra.mxu0 %v2840_v54 }
 0x41b   : > { %v2990_v19 = vpop.eup %2989  ;;  %v1005_v20 = vadd.f32 %v1004_v18, %v3540_v61  ;;  %2845 = vmatprep.subr.bf16.mxu0 %v2844_v56 }
 0x41c   : > { %v2992_v21 = vpop.eup %2991  ;;  %2459 = vmatprep.mubr.f32.mxu0 %v2990_v19 }
 0x41d   : > { %3001 = vtanh.f32 %v1005_v20  ;;  %v2417_v23 = vpop.f32.mrb[26].mxu1  ;;  %2460 = vmatmul.mubr.f32.gmra.mrb[34].mxu0 %v2992_v21 }
 0x41e   : > { %3003 = vtanh.f32 %v1010_v17  ;;  %v1020_v25 = vadd.f32 %v2417_v23, %v3540_v61  ;;  %v1014_v26 = vpop.f32.mrb[27].mxu1  ;;  %2847 = vmatpush3.bf16.msra.mxu0 %v2844_v56 }
 0x41f   : > { %v2994_v27 = vpop.eup %2993  ;;  %v1015_v28 = vadd.f32 %v1014_v26, %v3540_v61  ;;  %2849 = vmatprep.subr.bf16.mxu0 %v2848_v59 }
 0x420   : > { %v2996_v29 = vpop.eup %2995  ;;  %2462 = vmatprep.mubr.f32.mxu0 %v2994_v27 }
 0x421   : > { %3005 = vtanh.f32 %v1015_v28  ;;  %v2420_v30 = vpop.f32.mrb[28].mxu1  ;;  %2463 = vmatmul.mubr.f32.gmra.mrb[36].mxu0 %v2996_v29 }
 0x422   : > { %3007 = vtanh.f32 %v1020_v25  ;;  %v1030_v31 = vadd.f32 %v2420_v30, %v3540_v61  ;;  %v1024_v32 = vpop.f32.mrb[29].mxu1  ;;  %2851 = vmatpush3.bf16.msra.mxu0 %v2848_v59  ;;  %v1438_v59 = vld [vmem:[#allocation7 + $0x2f0] sm:$0xff] }
 0x423   : > { %v2998_v33 = vpop.eup %2997  ;;  %v1025_v34 = vadd.f32 %v1024_v32, %v3540_v61 }
 0x424   : > { %v3000_v35 = vpop.eup %2999  ;;  %2465 = vmatprep.mubr.f32.mxu0 %v2998_v33 }
 0x425   : > { %3009 = vtanh.f32 %v1025_v34  ;;  %v2423_v36 = vpop.f32.mrb[30].mxu1  ;;  %2466 = vmatmul.mubr.f32.gmra.mrb[38].mxu0 %v3000_v35 }
 0x426   : > { %3011 = vtanh.f32 %v1030_v31  ;;  %v1040_v37 = vadd.f32 %v2423_v36, %v3540_v61  ;;  %v1034_v38 = vpop.f32.mrb[31].mxu1 }
 0x427   : > { %v3002_v39 = vpop.eup %3001  ;;  %v1035_v40 = vadd.f32 %v1034_v38, %v3540_v61  ;;  %v1431_v61 = vld [vmem:[#allocation7 + $0x2b8] sm:$0xff] }
 0x428   : > { %v3004_v41 = vpop.eup %3003  ;;  %2468 = vmatprep.mubr.f32.mxu0 %v3002_v39  ;;  %v2852_v62 = vpack.c.bf16 %v1431_v61, %v1430_v60  ;;  %v1439_v60 = vld [vmem:[#allocation7 + $0x2f8] sm:$0xff] }
 0x429   : > { %3013 = vtanh.f32 %v1035_v40  ;;  %2469 = vmatmul.mubr.f32.gmra.mrb[40].mxu0 %v3004_v41  ;;  %v2868_v61 = vpack.c.bf16 %v1439_v60, %v1438_v59 }
 0x42a   : > { %3015 = vtanh.f32 %v1040_v37  ;;  %2853 = vmatprep.subr.bf16.mxu0 %v2852_v62 }
 0x42b   : > { %v3006_v42 = vpop.eup %3005  ;;  %2855 = vmatpush3.bf16.msra.mxu0 %v2852_v62  ;;  %v1605_v62 = vld [vmem:[#allocation8] sm:$0xff] }
 0x42c   : > { %v3008_v43 = vpop.eup %3007  ;;  %2471 = vmatprep.mubr.f32.mxu0 %v3006_v42  ;;  %2857 = vmatprep.subr.bf16.mxu0 %v2856_v1 }
 0x42d   : > { %2472 = vmatmul.mubr.f32.gmra.mrb[42].mxu0 %v3008_v43 }
 0x42f   : > { %v3010_v44 = vpop.eup %3009  ;;  %2859 = vmatpush3.bf16.msra.mxu0 %v2856_v1  ;;  %v2872_v1 = vpack.c.bf16 %v1606_v63, %v1605_v62 }
 0x430   : > { %v3012_v45 = vpop.eup %3011  ;;  %2474 = vmatprep.mubr.f32.mxu0 %v3010_v44  ;;  %2861 = vmatprep.subr.bf16.mxu0 %v2860_v4 }
 0x431   : > { %2475 = vmatmul.mubr.f32.gmra.mrb[44].mxu0 %v3012_v45  ;;  %2873 = vmatprep.subr.bf16.mxu1 %v2872_v1 }
 0x433   : > { %v3014_v46 = vpop.eup %3013  ;;  %2863 = vmatpush3.bf16.msra.mxu0 %v2860_v4  ;;  %v1609_v4 = vld [vmem:[#allocation8 + $0x20] sm:$0xff] }
 0x434   : > { %v3016_v47 = vpop.eup %3015  ;;  %2477 = vmatprep.mubr.f32.mxu0 %v3014_v46  ;;  %2865 = vmatprep.subr.bf16.mxu0 %v2864_v7  ;;  %v2880_v6 = vpack.c.bf16 %v1610_v5, %v1609_v4 }
 0x435   : > { %2478 = vmatmul.mubr.f32.gmra.mrb[46].mxu0 %v3016_v47 }
 0x437   : > { %2867 = vmatpush3.bf16.msra.mxu0 %v2864_v7  ;;  %v1611_v7 = vld [vmem:[#allocation8 + $0x30] sm:$0xff] }
 0x438   : > { %2869 = vmatprep.subr.bf16.mxu0 %v2868_v61 }
 0x43b   : > { %2871 = vmatpush3.bf16.msra.mxu0 %v2868_v61 }
 0x4ec   : > { %v2458_v10 = vpop.f32.mrb[32].mxu0 }
 0x4ed   : > { %v1152_v11 = vadd.f32 %v2458_v10, %v1079_v9  ;;  %v1146_v12 = vpop.f32.mrb[33].mxu0  ;;  %v1613_v10 = vld [vmem:[#allocation8 + $0x40] sm:$0xff] }
 0x4ee   : > { %v1147_v13 = vadd.f32 %v1146_v12, %v1079_v9 }
 0x4ef   : > { %v1226_v16 = vmax.f32 %v1152_v11, 0.0  ;;  %v1614_v11 = vld [vmem:[#allocation8 + $0x48] sm:$0xff] }
 0x4f0   : > { %v1225_v14 = vmax.f32 %v1147_v13, 0.0  ;;  %v2461_v15 = vpop.f32.mrb[34].mxu0  ;;  %v2888_v12 = vpack.c.bf16 %v1614_v11, %v1613_v10  ;;  %v1615_v13 = vld [vmem:[#allocation8 + $0x50] sm:$0xff]  ;;  %v1442_v10 = vsub.s32 6, %v3525_v22 }
 0x4f1   : > { %v1162_v17 = vadd.f32 %v2461_v15, %v1079_v9  ;;  %v1156_v18 = vpop.f32.mrb[35].mxu0 }
 0x4f2   : > { %v1157_v19 = vadd.f32 %v1156_v18, %v1079_v9  ;;  %2512 = vmatprep.mubr.f32.mxu1 %v1225_v14  ;;  %v1616_v14 = vld [vmem:[#allocation8 + $0x58] sm:$0xff] }
 0x4f3   : > { %2513 = vmatmul.mubr.f32.vlgmr.msra.gmra.mrb[32].mxu1 %v1226_v16  ;;  %v1228_v23 = vmax.f32 %v1162_v17, 0.0  ;;  %v2892_v15 = vpack.c.bf16 %v1616_v14, %v1615_v13  ;;  %v1617_v16 = vld [vmem:[#allocation8 + $0x60] sm:$0xff]  ;;  %v1618_v17 = vld [vmem:[#allocation8 + $0x68] sm:$0xff] }
 0x4f4   : > { %v1227_v20 = vmax.f32 %v1157_v19, 0.0  ;;  %v2464_v21 = vpop.f32.mrb[36].mxu0  ;;  %2875 = vmatpush3.bf16.msra.mxu1 %v2872_v1  ;;  %v2896_v18 = vpack.c.bf16 %v1618_v17, %v1617_v16  ;;  %v1260_v19 = vsub.s32 5, %v3525_v22 }
 0x4f5   : > { %v1172_v25 = vadd.f32 %v2464_v21, %v1079_v9  ;;  %v1166_v26 = vpop.f32.mrb[37].mxu0  ;;  %2877 = vmatprep.subr.bf16.mxu1 %v2876_v3 }
 0x4f6   : > { %v1167_v27 = vadd.f32 %v1166_v26, %v1079_v9  ;;  %2515 = vmatprep.mubr.f32.mxu1 %v1227_v20  ;;  %v3564_v20 = vld [vmem:[%s3664_s3] sm:$0xff] }
 0x4f7   : > { %2516 = vmatmul.mubr.f32.gmra.mrb[34].mxu1 %v1228_v23  ;;  %v1230_v29 = vmax.f32 %v1172_v25, 0.0  ;;  %v1261_v21 = vrot.slane %v3564_v20, %v1260_v19  ;;  %v1443_v11 = vrot.slane %v3564_v20, %v1442_v10 }
 0x4f8   : > { %v1229_v24 = vmax.f32 %v1167_v27, 0.0  ;;  %v2467_v28 = vpop.f32.mrb[38].mxu0  ;;  %2879 = vmatpush3.bf16.msra.mxu1 %v2876_v3 }
 0x4f9   : > { %v1182_v30 = vadd.f32 %v2467_v28, %v1079_v9  ;;  %v1176_v31 = vpop.f32.mrb[39].mxu0  ;;  %2881 = vmatprep.subr.bf16.mxu1 %v2880_v6 }
 0x4fa   : > { %v1177_v32 = vadd.f32 %v1176_v31, %v1079_v9  ;;  %2518 = vmatprep.mubr.f32.mxu1 %v1229_v24 }
 0x4fb   : > { %2519 = vmatmul.mubr.f32.gmra.mrb[36].mxu1 %v1230_v29  ;;  %v1232_v35 = vmax.f32 %v1182_v30, 0.0 }
 0x4fc   : > { %v1231_v33 = vmax.f32 %v1177_v32, 0.0  ;;  %v2470_v34 = vpop.f32.mrb[40].mxu0  ;;  %2883 = vmatpush3.bf16.msra.mxu1 %v2880_v6 }
 0x4fd   : > { %v1192_v36 = vadd.f32 %v2470_v34, %v1079_v9  ;;  %v1186_v37 = vpop.f32.mrb[41].mxu0 }
 0x4fe   : > { %v1187_v38 = vadd.f32 %v1186_v37, %v1079_v9  ;;  %2521 = vmatprep.mubr.f32.mxu1 %v1231_v33 }
 0x4ff   : > { %2522 = vmatmul.mubr.f32.gmra.mrb[38].mxu1 %v1232_v35  ;;  %v1234_v41 = vmax.f32 %v1192_v36, 0.0 }
 0x500   : > { %v1233_v39 = vmax.f32 %v1187_v38, 0.0  ;;  %v2473_v40 = vpop.f32.mrb[42].mxu0 }
 0x501   : > { %v1202_v42 = vadd.f32 %v2473_v40, %v1079_v9  ;;  %v1196_v43 = vpop.f32.mrb[43].mxu0 }
 0x502   : > { %v1197_v44 = vadd.f32 %v1196_v43, %v1079_v9  ;;  %2524 = vmatprep.mubr.f32.mxu1 %v1233_v39 }
 0x503   : > { %2525 = vmatmul.mubr.f32.gmra.mrb[40].mxu1 %v1234_v41  ;;  %v1236_v47 = vmax.f32 %v1202_v42, 0.0 }
 0x504   : > { %v1235_v45 = vmax.f32 %v1197_v44, 0.0  ;;  %v2476_v46 = vpop.f32.mrb[44].mxu0 }
 0x505   : > { %v1212_v48 = vadd.f32 %v2476_v46, %v1079_v9  ;;  %v1206_v49 = vpop.f32.mrb[45].mxu0 }
 0x506   : > { %v1207_v50 = vadd.f32 %v1206_v49, %v1079_v9  ;;  %2527 = vmatprep.mubr.f32.mxu1 %v1235_v45 }
 0x507   : > { %2528 = vmatmul.mubr.f32.gmra.mrb[42].mxu1 %v1236_v47  ;;  %v1238_v53 = vmax.f32 %v1212_v48, 0.0 }
 0x508   : > { %v1237_v51 = vmax.f32 %v1207_v50, 0.0  ;;  %v2479_v52 = vpop.f32.mrb[46].mxu0 }
 0x509   : > { %v1222_v54 = vadd.f32 %v2479_v52, %v1079_v9  ;;  %v1216_v55 = vpop.f32.mrb[47].mxu0 }
 0x50a   : > { %v1217_v56 = vadd.f32 %v1216_v55, %v1079_v9  ;;  %2530 = vmatprep.mubr.f32.mxu1 %v1237_v51  ;;  %v2884_v9 = vpack.c.bf16 %v1612_v8, %v1611_v7  ;;  %v1619_v7 = vld [vmem:[#allocation8 + $0x70] sm:$0xff]  ;;  %v1620_v8 = vld [vmem:[#allocation8 + $0x78] sm:$0xff] }
 0x50b   : > { %2531 = vmatmul.mubr.f32.gmra.mrb[44].mxu1 %v1238_v53  ;;  %v1240_v58 = vmax.f32 %v1222_v54, 0.0 }
 0x50c   : > { %v1239_v57 = vmax.f32 %v1217_v56, 0.0  ;;  %2885 = vmatprep.subr.bf16.mxu1 %v2884_v9 }
 0x50d   : > { %2887 = vmatpush3.bf16.msra.mxu1 %v2884_v9  ;;  %v2900_v9 = vpack.c.bf16 %v1620_v8, %v1619_v7 }
 0x50e   : > { %2533 = vmatprep.mubr.f32.mxu1 %v1239_v57  ;;  %2889 = vmatprep.subr.bf16.mxu1 %v2888_v12 }
 0x50f   : > { %2534 = vmatmul.mubr.f32.gmra.mrb[46].mxu1 %v1240_v58 }
 0x511   : > { %2891 = vmatpush3.bf16.msra.mxu1 %v2888_v12 }
 0x512   : > { %2893 = vmatprep.subr.bf16.mxu1 %v2892_v15 }
 0x515   : > { %2895 = vmatpush3.bf16.msra.mxu1 %v2892_v15 }
 0x516   : > { %2897 = vmatprep.subr.bf16.mxu1 %v2896_v18 }
 0x519   : > { %2899 = vmatpush3.bf16.msra.mxu1 %v2896_v18 }
 0x51a   : > { %2901 = vmatprep.subr.bf16.mxu1 %v2900_v9 }
 0x51d   : > { %2903 = vmatpush3.bf16.msra.mxu1 %v2900_v9 }
 0x5c6   : > { %v2514_v23 = vpop.f32.mrb[32].mxu1 }
 0x5c7   : > { %v1334_v25 = vadd.f32 %v2514_v23, %v1261_v21  ;;  %v1328_v26 = vpop.f32.mrb[33].mxu1 }
 0x5c8   : > { %v1329_v27 = vadd.f32 %v1328_v26, %v1261_v21 }
 0x5c9   : > { %v1408_v29 = vmax.f32 %v1334_v25, 0.0 }
 0x5ca   : > { %v1407_v24 = vmax.f32 %v1329_v27, 0.0  ;;  %v2517_v28 = vpop.f32.mrb[34].mxu1 }
 0x5cb   : > { %v1344_v30 = vadd.f32 %v2517_v28, %v1261_v21  ;;  %v1338_v31 = vpop.f32.mrb[35].mxu1 }
 0x5cc   : > { %v1339_v32 = vadd.f32 %v1338_v31, %v1261_v21  ;;  %2568 = vmatprep.mubr.f32.mxu0 %v1407_v24 }
 0x5cd   : > { %2569 = vmatmul.mubr.f32.vlgmr.msra.gmra.mrb[48].mxu0 %v1408_v29  ;;  %v1410_v35 = vmax.f32 %v1344_v30, 0.0 }
 0x5ce   : > { %v1409_v33 = vmax.f32 %v1339_v32, 0.0  ;;  %v2520_v34 = vpop.f32.mrb[36].mxu1 }
 0x5cf   : > { %v1354_v36 = vadd.f32 %v2520_v34, %v1261_v21  ;;  %v1348_v37 = vpop.f32.mrb[37].mxu1 }
 0x5d0   : > { %v1349_v38 = vadd.f32 %v1348_v37, %v1261_v21  ;;  %2571 = vmatprep.mubr.f32.mxu0 %v1409_v33 }
 0x5d1   : > { %2572 = vmatmul.mubr.f32.gmra.mrb[50].mxu0 %v1410_v35  ;;  %v1412_v41 = vmax.f32 %v1354_v36, 0.0 }
 0x5d2   : > { %v1411_v39 = vmax.f32 %v1349_v38, 0.0  ;;  %v2523_v40 = vpop.f32.mrb[38].mxu1 }
 0x5d3   : > { %v1364_v42 = vadd.f32 %v2523_v40, %v1261_v21  ;;  %v1358_v43 = vpop.f32.mrb[39].mxu1 }
 0x5d4   : > { %v1359_v44 = vadd.f32 %v1358_v43, %v1261_v21  ;;  %2574 = vmatprep.mubr.f32.mxu0 %v1411_v39 }
 0x5d5   : > { %2575 = vmatmul.mubr.f32.gmra.mrb[52].mxu0 %v1412_v41  ;;  %v1414_v47 = vmax.f32 %v1364_v42, 0.0 }
 0x5d6   : > { %v1413_v45 = vmax.f32 %v1359_v44, 0.0  ;;  %v2526_v46 = vpop.f32.mrb[40].mxu1 }
 0x5d7   : > { %v1374_v48 = vadd.f32 %v2526_v46, %v1261_v21  ;;  %v1368_v49 = vpop.f32.mrb[41].mxu1 }
 0x5d8   : > { %v1369_v50 = vadd.f32 %v1368_v49, %v1261_v21  ;;  %2577 = vmatprep.mubr.f32.mxu0 %v1413_v45 }
 0x5d9   : > { %2578 = vmatmul.mubr.f32.gmra.mrb[54].mxu0 %v1414_v47  ;;  %v1416_v53 = vmax.f32 %v1374_v48, 0.0 }
 0x5da   : > { %v1415_v51 = vmax.f32 %v1369_v50, 0.0  ;;  %v2529_v52 = vpop.f32.mrb[42].mxu1 }
 0x5db   : > { %v1384_v54 = vadd.f32 %v2529_v52, %v1261_v21  ;;  %v1378_v55 = vpop.f32.mrb[43].mxu1 }
 0x5dc   : > { %v1379_v56 = vadd.f32 %v1378_v55, %v1261_v21  ;;  %2580 = vmatprep.mubr.f32.mxu0 %v1415_v51 }
 0x5dd   : > { %2581 = vmatmul.mubr.f32.gmra.mrb[56].mxu0 %v1416_v53  ;;  %v1418_v59 = vmax.f32 %v1384_v54, 0.0 }
 0x5de   : > { %v1417_v57 = vmax.f32 %v1379_v56, 0.0  ;;  %v2532_v58 = vpop.f32.mrb[44].mxu1 }
 0x5df   : > { %v1394_v60 = vadd.f32 %v2532_v58, %v1261_v21  ;;  %v1388_v61 = vpop.f32.mrb[45].mxu1 }
 0x5e0   : > { %v1389_v62 = vadd.f32 %v1388_v61, %v1261_v21  ;;  %2583 = vmatprep.mubr.f32.mxu0 %v1417_v57 }
 0x5e1   : > { %2584 = vmatmul.mubr.f32.gmra.mrb[58].mxu0 %v1418_v59  ;;  %v1420_v1 = vmax.f32 %v1394_v60, 0.0  ;;  %v3572_v60 = vld [vmem:[%s3666_s5] ss:$0 sm:$0xff] }
 0x5e2   : > { %v1419_v63 = vmax.f32 %v1389_v62, 0.0  ;;  %v2535_v0 = vpop.f32.mrb[46].mxu1 }
 0x5e3   : > { %v1404_v2 = vadd.f32 %v2535_v0, %v1261_v21  ;;  %v1398_v3 = vpop.f32.mrb[47].mxu1 }
 0x5e4   : > { %v1399_v4 = vadd.f32 %v1398_v3, %v1261_v21  ;;  %2586 = vmatprep.mubr.f32.mxu0 %v1419_v63 }
 0x5e5   : > { %2587 = vmatmul.mubr.f32.gmra.mrb[60].mxu0 %v1420_v1  ;;  %v1422_v6 = vmax.f32 %v1404_v2, 0.0 }
 0x5e6   : > { %v1421_v5 = vmax.f32 %v1399_v4, 0.0 }
 0x5e8   : > { %2589 = vmatprep.mubr.f32.mxu0 %v1421_v5 }
 0x5e9   : > { %2590 = vmatmul.mubr.f32.gmra.mrb[62].mxu0 %v1422_v6 }
 0x6a0   : > { %v2570_v12 = vpop.f32.mrb[48].mxu0 }
 0x6a1   : > { %v1516_v13 = vadd.f32 %v2570_v12, %v1443_v11  ;;  %v1510_v14 = vpop.f32.mrb[49].mxu0 }
 0x6a2   : > { %v1511_v15 = vadd.f32 %v1510_v14, %v1443_v11 }
 0x6a3   : > { %v1590_v18 = vmax.f32 %v1516_v13, 0.0 }
 0x6a4   : > { %v1589_v16 = vmax.f32 %v1511_v15, 0.0  ;;  %v2573_v17 = vpop.f32.mrb[50].mxu0 }
 0x6a5   : > { %v1526_v19 = vadd.f32 %v2573_v17, %v1443_v11  ;;  %v1520_v21 = vpop.f32.mrb[51].mxu0 }
 0x6a6   : > { %v1521_v23 = vadd.f32 %v1520_v21, %v1443_v11  ;;  %2624 = vmatprep.mubr.f32.mxu1 %v1589_v16 }
 0x6a7   : > { %2625 = vmatmul.mubr.f32.vlgmr.msra.gmra.mrb[48].mxu1 %v1590_v18  ;;  %v1592_v27 = vmax.f32 %v1526_v19, 0.0 }
 0x6a8   : > { %v1591_v25 = vmax.f32 %v1521_v23, 0.0  ;;  %v2576_v26 = vpop.f32.mrb[52].mxu0 }
 0x6a9   : > { %v1536_v24 = vadd.f32 %v2576_v26, %v1443_v11  ;;  %v1530_v28 = vpop.f32.mrb[53].mxu0 }
 0x6aa   : > { %v1531_v22 = vadd.f32 %v1530_v28, %v1443_v11  ;;  %2627 = vmatprep.mubr.f32.mxu1 %v1591_v25 }
 0x6ab   : > { %2628 = vmatmul.mubr.f32.gmra.mrb[50].mxu1 %v1592_v27  ;;  %v1594_v30 = vmax.f32 %v1536_v24, 0.0 }
 0x6ac   : > { %v1593_v20 = vmax.f32 %v1531_v22, 0.0  ;;  %v2579_v29 = vpop.f32.mrb[54].mxu0 }
 0x6ad   : > { %v1546_v31 = vadd.f32 %v2579_v29, %v1443_v11  ;;  %v1540_v32 = vpop.f32.mrb[55].mxu0 }
 0x6ae   : > { %v1541_v33 = vadd.f32 %v1540_v32, %v1443_v11  ;;  %2630 = vmatprep.mubr.f32.mxu1 %v1593_v20 }
 0x6af   : > { %2631 = vmatmul.mubr.f32.gmra.mrb[52].mxu1 %v1594_v30  ;;  %v1596_v36 = vmax.f32 %v1546_v31, 0.0 }
 0x6b0   : > { %v1595_v34 = vmax.f32 %v1541_v33, 0.0  ;;  %v2582_v35 = vpop.f32.mrb[56].mxu0 }
 0x6b1   : > { %v1556_v37 = vadd.f32 %v2582_v35, %v1443_v11  ;;  %v1550_v38 = vpop.f32.mrb[57].mxu0 }
 0x6b2   : > { %v1551_v39 = vadd.f32 %v1550_v38, %v1443_v11  ;;  %2633 = vmatprep.mubr.f32.mxu1 %v1595_v34 }
 0x6b3   : > { %2634 = vmatmul.mubr.f32.gmra.mrb[54].mxu1 %v1596_v36  ;;  %v1598_v42 = vmax.f32 %v1556_v37, 0.0 }
 0x6b4   : > { %v1597_v40 = vmax.f32 %v1551_v39, 0.0  ;;  %v2585_v41 = vpop.f32.mrb[58].mxu0 }
 0x6b5   : > { %v1566_v43 = vadd.f32 %v2585_v41, %v1443_v11  ;;  %v1560_v44 = vpop.f32.mrb[59].mxu0 }
 0x6b6   : > { %v1561_v45 = vadd.f32 %v1560_v44, %v1443_v11  ;;  %2636 = vmatprep.mubr.f32.mxu1 %v1597_v40 }
 0x6b7   : > { %2637 = vmatmul.mubr.f32.gmra.mrb[56].mxu1 %v1598_v42  ;;  %v1600_v48 = vmax.f32 %v1566_v43, 0.0 }
 0x6b8   : > { %v1599_v46 = vmax.f32 %v1561_v45, 0.0  ;;  %v2588_v47 = vpop.f32.mrb[60].mxu0 }
 0x6b9   : > { %v1576_v49 = vadd.f32 %v2588_v47, %v1443_v11  ;;  %v1570_v50 = vpop.f32.mrb[61].mxu0 }
 0x6ba   : > { %v1571_v51 = vadd.f32 %v1570_v50, %v1443_v11  ;;  %2639 = vmatprep.mubr.f32.mxu1 %v1599_v46 }
 0x6bb   : > { %2640 = vmatmul.mubr.f32.gmra.mrb[58].mxu1 %v1600_v48  ;;  %v1602_v54 = vmax.f32 %v1576_v49, 0.0 }
 0x6bc   : > { %v1601_v52 = vmax.f32 %v1571_v51, 0.0  ;;  %v2591_v53 = vpop.f32.mrb[62].mxu0 }
 0x6bd   : > { %v1586_v55 = vadd.f32 %v2591_v53, %v1443_v11  ;;  %v1580_v56 = vpop.f32.mrb[63].mxu0 }
 0x6be   : > { %v1581_v57 = vadd.f32 %v1580_v56, %v1443_v11  ;;  %2642 = vmatprep.mubr.f32.mxu1 %v1601_v52 }
 0x6bf   : > { %2643 = vmatmul.mubr.f32.gmra.mrb[60].mxu1 %v1602_v54  ;;  %v1604_v59 = vmax.f32 %v1586_v55, 0.0 }
 0x6c0   : > { %v1603_v58 = vmax.f32 %v1581_v57, 0.0 }
 0x6c2   : > { %2645 = vmatprep.mubr.f32.mxu1 %v1603_v58 }
 0x6c3   : > { %2646 = vmatmul.mubr.f32.gmra.mrb[62].mxu1 %v1604_v59 }
 0x77a   : > { %v2626_v61 = vpop.f32.mrb[48].mxu1 }
 0x77b   : > { %v1700_v62 = vadd.f32 %v2626_v61, %v3572_v60  ;;  %v1694_v63 = vpop.f32.mrb[49].mxu1 }
 0x77c   : > { %v1695_v0 = vadd.f32 %v3572_v60, %v1694_v63 }
 0x77d   : > { %3017 = vtanh.f32 %v1700_v62 }
 0x77e   : > { %3019 = vtanh.f32 %v1695_v0  ;;  %v2629_v1 = vpop.f32.mrb[50].mxu1 }
 0x77f   : > { %v1710_v2 = vadd.f32 %v2629_v1, %v3572_v60  ;;  %v1704_v3 = vpop.f32.mrb[51].mxu1 }
 0x780   : > { %v1705_v4 = vadd.f32 %v3572_v60, %v1704_v3 }
 0x781   : > { %3021 = vtanh.f32 %v1710_v2 }
 0x782   : > { %3023 = vtanh.f32 %v1705_v4  ;;  %v2632_v5 = vpop.f32.mrb[52].mxu1 }
 0x783   : > { %v1720_v6 = vadd.f32 %v2632_v5, %v3572_v60  ;;  %v1714_v7 = vpop.f32.mrb[53].mxu1 }
 0x784   : > { %v1715_v8 = vadd.f32 %v3572_v60, %v1714_v7 }
 0x785   : > { %3025 = vtanh.f32 %v1720_v6 }
 0x786   : > { %3027 = vtanh.f32 %v1715_v8  ;;  %v2635_v9 = vpop.f32.mrb[54].mxu1 }
 0x787   : > { %v3018_v10 = vpop.eup %3017  ;;  %v1730_v11 = vadd.f32 %v2635_v9, %v3572_v60  ;;  %v1724_v12 = vpop.f32.mrb[55].mxu1 }
 0x788   : > { %v3020_v13 = vpop.eup %3019  ;;  %1790 = vst [vmem:[%s3583_s8 + $0x8] sm:$0xff] %v3018_v10  ;;  %v1725_v14 = vadd.f32 %v3572_v60, %v1724_v12 }
 0x789   : > { %1789 = vst [vmem:[%s3583_s8] sm:$0xff] %v3020_v13  ;;  %3029 = vtanh.f32 %v1730_v11 }
 0x78a   : > { %3031 = vtanh.f32 %v1725_v14  ;;  %v2638_v15 = vpop.f32.mrb[56].mxu1 }
 0x78b   : > { %v3022_v16 = vpop.eup %3021  ;;  %v1740_v17 = vadd.f32 %v2638_v15, %v3572_v60  ;;  %v1734_v18 = vpop.f32.mrb[57].mxu1 }
 0x78c   : > { %v3024_v19 = vpop.eup %3023  ;;  %1792 = vst [vmem:[%s3583_s8 + $0x18] sm:$0xff] %v3022_v16  ;;  %v1735_v21 = vadd.f32 %v3572_v60, %v1734_v18 }
 0x78d   : > { %1791 = vst [vmem:[%s3583_s8 + $0x10] sm:$0xff] %v3024_v19  ;;  %3033 = vtanh.f32 %v1740_v17 }
 0x78e   : > { %3035 = vtanh.f32 %v1735_v21  ;;  %v2641_v23 = vpop.f32.mrb[58].mxu1 }
 0x78f   : > { %v3026_v25 = vpop.eup %3025  ;;  %v1750_v26 = vadd.f32 %v2641_v23, %v3572_v60  ;;  %v1744_v27 = vpop.f32.mrb[59].mxu1 }
 0x790   : > { %v3028_v24 = vpop.eup %3027  ;;  %1794 = vst [vmem:[%s3583_s8 + $0x28] sm:$0xff] %v3026_v25  ;;  %v1745_v28 = vadd.f32 %v3572_v60, %v1744_v27 }
 0x791   : > { %1793 = vst [vmem:[%s3583_s8 + $0x20] sm:$0xff] %v3028_v24  ;;  %3037 = vtanh.f32 %v1750_v26 }
 0x792   : > { %3039 = vtanh.f32 %v1745_v28  ;;  %v2644_v22 = vpop.f32.mrb[60].mxu1 }
 0x793   : > { %v3030_v20 = vpop.eup %3029  ;;  %v1760_v29 = vadd.f32 %v2644_v22, %v3572_v60  ;;  %v1754_v30 = vpop.f32.mrb[61].mxu1 }
 0x794   : > { %v3032_v31 = vpop.eup %3031  ;;  %1796 = vst [vmem:[%s3583_s8 + $0x38] sm:$0xff] %v3030_v20  ;;  %v1755_v32 = vadd.f32 %v3572_v60, %v1754_v30 }
 0x795   : > { %1795 = vst [vmem:[%s3583_s8 + $0x30] sm:$0xff] %v3032_v31  ;;  %3041 = vtanh.f32 %v1760_v29 }
 0x796   : > { %3043 = vtanh.f32 %v1755_v32  ;;  %v2647_v33 = vpop.f32.mrb[62].mxu1 }
 0x797   : > { %v3034_v34 = vpop.eup %3033  ;;  %v1770_v35 = vadd.f32 %v2647_v33, %v3572_v60  ;;  %v1764_v36 = vpop.f32.mrb[63].mxu1 }
 0x798   : > { %v3036_v37 = vpop.eup %3035  ;;  %1798 = vst [vmem:[%s3583_s8 + $0x48] sm:$0xff] %v3034_v34  ;;  %v1765_v38 = vadd.f32 %v3572_v60, %v1764_v36 }
 0x799   : > { %1797 = vst [vmem:[%s3583_s8 + $0x40] sm:$0xff] %v3036_v37  ;;  %3045 = vtanh.f32 %v1770_v35 }
 0x79a   : > { %3047 = vtanh.f32 %v1765_v38 }
 0x79b   : > { %v3038_v39 = vpop.eup %3037 }
 0x79c   : > { %v3040_v40 = vpop.eup %3039  ;;  %1800 = vst [vmem:[%s3583_s8 + $0x58] sm:$0xff] %v3038_v39 }
 0x79d   : > { %1799 = vst [vmem:[%s3583_s8 + $0x50] sm:$0xff] %v3040_v40 }
 0x79f   : > { %v3042_v41 = vpop.eup %3041 }
 0x7a0   : > { %v3044_v42 = vpop.eup %3043  ;;  %1802 = vst [vmem:[%s3583_s8 + $0x68] sm:$0xff] %v3042_v41 }
 0x7a1   : > { %1801 = vst [vmem:[%s3583_s8 + $0x60] sm:$0xff] %v3044_v42 }
 0x7a3   : > { %v3046_v43 = vpop.eup %3045 }
 0x7a4   : > { %v3048_v44 = vpop.eup %3047  ;;  %1804 = vst [vmem:[%s3583_s8 + $0x78] sm:$0xff] %v3046_v43 }
 0x7a5   : > { %1803 = vst [vmem:[%s3583_s8 + $0x70] sm:$0xff] %v3048_v44 }
 0x7a6   : > { %3177 = shalt.err (!%p3174_p4)
}
 0x7a7   : > { %s3178_s30 = scalar_lea.hbm %s3613_s19, 2048  ;;  %s3182_s10 = scalar_lea.hbm %s3667_s6, 4096 }
 0x7a8   : > { %p3179_p9 = scmp.ne.s32.totalorder %s3613_s19, %s3178_s30  ;;  %p3183_p8 = scmp.lt.u32.totalorder %s3613_s19, %s3667_s6 }
 0x7a9   : > { %p3184_p13 = scmp.lt.u32.totalorder %s3182_s10, %s3178_s30  ;;  %p3186_p10 = scmp.lt.u32.totalorder %s3178_s30, %s3613_s19 }
 0x7aa   : > { %p3180_p0 = pnand %p3179_p9, %p3438_p5 }
 0x7ab   : > { %p3185_p6 = por %p3184_p13, %p3183_p8 }
 0x7ac   : > { %p3181_p11 = pneg %p3180_p0 }
 0x7ad   : > { %p3187_p3 = por %p3186_p10, %p3185_p6 }
 0x7af   : > { %p3188_p7 = pnand %p3187_p3, %p3181_p11 }
 0x7b1   : > { %3191 = shalt.err (!%p3188_p7)
}
 0x7b2   : > { %s3247_s12 = smov 128   ;;  %s3248_s20 = smov 8  }
 0x7b3   : > { %2918 = dma.vmem_to_hbm [thread:$0]  (%p3438_p5), %s3615_s17, 2048, %s3613_s19, %s1806_s7, %s3247_s12, %s3247_s12, %s3248_s20  }
 0x7b4 PF: > { %s1834_s25 = sand.u32 1, %s3226_s21   ;;  %p3685_p12 = scmp.ne.s32.totalorder %s3672_s28, 0 }
 0x7b5   : > { %p3686_p1 = scmp.ge.s32.totalorder %s3238_s24, 2  ;;  %s1835_s11 = scalar_lea.sflag [#allocation4], %s1834_s25 }
 0x7b7   : > { %p2935_p2 = pnand %p3686_p1, %p3685_p12 }
 0x7b9   : > { %3221 = dma.done.wait (!%p2935_p2), %s1835_s11, 2048  }
 0x7ba   : > { %3223 = vsyncadd (!%p2935_p2), %s1835_s11, 4294965248  ;;  %p21_p4 = scmp.ge.s32.totalorder %s3424_s18, 4   ;;  %s3687_s21 = smov %s3230_s22 }
 0x7bb   : > { %s3688_s22 = smov %s3234_s23  ;;  %s3689_s23 = smov %s3434_s14 }
 0x7bc   : > { %s3690_s24 = smov %s3424_s18  ;;  %23 = sbr.rel (!%p21_p4) target bundleno = 7 (0x7), region = 106 }
 0x7c3   :  { %1840 = vsyncpa [#allocation3], 1 }
 0x7c4   :  { %1842 = vsyncpa [#allocation3 + $0x1], 1 }
 0x7c5   :  { %1843 = vsyncpa [#allocation6], 1 }
 0x7c6   :  { %1844 = vsyncpa [#allocation9], 1 }
 0x7c7   :  { %1845 = vsyncpa [#allocation4], 1 }
 0x7c8   :  { %1847 = vsyncpa [#allocation4 + $0x1], 1 }

</bundles_post_ra>
